<compile_context>
chip_gen: v7x
topology: tpu7x:2x2x1
jax: 0.10.0
libtpu: 0.0.40
codegen_flags: <defaults>
</compile_context>

<pallas_src>
import jax
import jax.numpy as jnp
from jax.experimental import pallas as pl
from jax.experimental.pallas import tpu as pltpu

# ---- module-consistent configuration -----------------------------------------
INPUT_DIM = 35                     # 32 latent + 3 action  (input_dim = out_dim + 3)
LSTM_UNITS = 32                    # H (small hidden size for the demo)
MDN_H1, MDN_H2 = 100, 100          # mdn_layers=[100, 100]
NBR_GAUSS = 5
OUT_DIM = INPUT_DIM - 3            # 32
TEMP = 1.0
MDN_OUT = NBR_GAUSS + 2 * NBR_GAUSS * OUT_DIM    # 5 + 160 + 160 = 325

BATCH = 2
SEQ = 8

# ---- padded / fused layout constants ------------------------------------------
H4 = 4 * LSTM_UNITS                # 128 : fused gate width (i|f|g|o)
D_PAD = 64                         # input dim 35 zero-padded to 64
MDN_PAD = 128                      # MDN hidden 100 zero-padded to 128
COEFF_BLK = 128                    # pi block  [0, 128)
VAR_OFF, VAR_BLK = 128, 256        # var block [128, 384)
MEAN_OFF, MEAN_BLK = 384, 256      # mean block [384, 640)
SLAB_W = 640                       # 5 * 128 lane-dense output slab
NEG_BIG = -1e30                    # bias for pi pad columns -> exp() underflows to 0


# =========================== fused LSTM + MDN kernel ===========================
def mdn_rnn_kernel(x_ref, wih_ref, whh_ref, bl_ref,
                   w1_ref, b1_ref, w2_ref, b2_ref, w3_ref, b3_ref,
                   out_ref):
    B, T, H = BATCH, SEQ, LSTM_UNITS

    # ---- input projection for ALL timesteps, hoisted off the recurrence -------
    # (T*B, D_PAD) @ (D_PAD, 4H) -> (T*B, 128); bias (b_ih + b_hh) folded in here.
    xp = jnp.dot(x_ref[...], wih_ref[...],
                 preferred_element_type=jnp.float32) + bl_ref[...]
    whh = whh_ref[...]                                    # (H, 4H) = (32, 128)

    # ---- sequential recurrence, fully unrolled (T = 8) ------------------------
    h = jnp.zeros((B, H), jnp.float32)
    c = jnp.zeros((B, H), jnp.float32)
    hs = []
    for t in range(T):                                    # static unroll
        z = xp[t * B:(t + 1) * B, :] + jnp.dot(
            h, whh, preferred_element_type=jnp.float32)   # (B, 128) single matmul
        sz = jax.nn.sigmoid(z)                            # EUP over full 128 lanes
        tz = jnp.tanh(z)
        i_g = sz[:, 0 * H:1 * H]
        f_g = sz[:, 1 * H:2 * H]
        g_g = tz[:, 2 * H:3 * H]
        o_g = sz[:, 3 * H:4 * H]
        c = f_g * c + i_g * g_g
        h = o_g * jnp.tanh(c)
        hs.append(h)
    hs_all = jnp.concatenate(hs, axis=0)                  # (T*B, H), time-major

    # ---- MDN head, fused (hidden states never leave the kernel) ---------------
    h1 = jnp.maximum(jnp.dot(hs_all, w1_ref[...],
                             preferred_element_type=jnp.float32) + b1_ref[...], 0.0)
    h2 = jnp.maximum(jnp.dot(h1, w2_ref[...],
                             preferred_element_type=jnp.float32) + b2_ref[...], 0.0)
    h3 = jnp.dot(h2, w3_ref[...],
                 preferred_element_type=jnp.float32) + b3_ref[...]     # (T*B, 640)

    # pi block: softmax over lanes [0,128); pad columns carry bias -1e30 -> exp==0,
    # so it equals the 5-wide softmax of the reference.
    logits = h3[:, 0:COEFF_BLK] * (1.0 / TEMP)
    logits = logits - jnp.max(logits, axis=1, keepdims=True)
    e = jnp.exp(logits)
    coeff = e * pl.reciprocal(jnp.sum(e, axis=1, keepdims=True), approx=False)

    # lane-dense, 128-aligned stores into the single output slab
    out_ref[:, 0:COEFF_BLK] = coeff
    out_ref[:, VAR_OFF:VAR_OFF + VAR_BLK] = jnp.exp(h3[:, VAR_OFF:VAR_OFF + VAR_BLK]) * TEMP
    out_ref[:, MEAN_OFF:MEAN_OFF + MEAN_BLK] = h3[:, MEAN_OFF:MEAN_OFF + MEAN_BLK]


def mdn_rnn_pallas(x_flat_pad, kp):
    """x_flat_pad: (T*B, D_PAD) time-major flattened, zero-padded input."""
    N = x_flat_pad.shape[0]
    vmem_spec = lambda: pl.BlockSpec(memory_space=pltpu.MemorySpace.VMEM)
    return pl.pallas_call(
        mdn_rnn_kernel,
        out_shape=jax.ShapeDtypeStruct((N, SLAB_W), jnp.float32),
        in_specs=[vmem_spec() for _ in range(10)],
        out_specs=vmem_spec(),
    )(x_flat_pad, kp["wih"], kp["whh"], kp["b_lstm"],
      kp["w1"], kp["b1"], kp["w2"], kp["b2"], kp["w3"], kp["b3"])


# ============================== full forward pass ==============================
def mdn_rnn_forward(x_btd, kp):
    B, T, D = x_btd.shape
    # time-major flatten + zero-pad the contraction dim (done once, outside kernel)
    x_flat = jnp.transpose(x_btd, (1, 0, 2)).reshape(T * B, D)
    x_flat = jnp.pad(x_flat, ((0, 0), (0, D_PAD - D)))
    slab = mdn_rnn_pallas(x_flat, kp)                         # (T*B, 640) time-major
    slab = slab.reshape(T, B, SLAB_W).transpose(1, 0, 2)      # (B, T, 640)
    coeff = slab[..., :NBR_GAUSS]
    var = slab[..., VAR_OFF:VAR_OFF + NBR_GAUSS * OUT_DIM].reshape(B, T, NBR_GAUSS, OUT_DIM)
    mean = slab[..., MEAN_OFF:MEAN_OFF + NBR_GAUSS * OUT_DIM].reshape(B, T, NBR_GAUSS, OUT_DIM)
    return coeff, mean, var


# ============================== parameter handling =============================
def xavier_uniform(key, fan_in, fan_out):
    bound = jnp.sqrt(6.0 / (fan_in + fan_out))
    return jax.random.uniform(key, (fan_in, fan_out), jnp.float32, -bound, bound)


def init_params(key):
    """'Natural' per-gate PyTorch-like parameters (used directly by the reference)."""
    ks = jax.random.split(key, 12)
    k_lstm = 1.0 / jnp.sqrt(LSTM_UNITS)
    wih = jax.random.uniform(ks[0], (4, INPUT_DIM, LSTM_UNITS), jnp.float32, -k_lstm, k_lstm)
    whh = jax.random.uniform(ks[1], (4, LSTM_UNITS, LSTM_UNITS), jnp.float32, -k_lstm, k_lstm)
    b_ih = jax.random.uniform(ks[2], (4, 1, LSTM_UNITS), jnp.float32, -k_lstm, k_lstm)
    b_hh = jax.random.uniform(ks[3], (4, 1, LSTM_UNITS), jnp.float32, -k_lstm, k_lstm)
    return dict(
        wih=wih, whh=whh, b_lstm=b_ih + b_hh,
        w1=xavier_uniform(ks[4], LSTM_UNITS, MDN_H1),
        b1=jax.random.uniform(ks[5], (1, MDN_H1), jnp.float32, -0.1, 0.1),
        w2=xavier_uniform(ks[6], MDN_H1, MDN_H2),
        b2=jax.random.uniform(ks[7], (1, MDN_H2), jnp.float32, -0.1, 0.1),
        w3=xavier_uniform(ks[8], MDN_H2, MDN_OUT),
        b3=jax.random.uniform(ks[9], (1, MDN_OUT), jnp.float32, -0.1, 0.1),
    )


def _pad_cols(a, width, fill=0.0):
    return jnp.pad(a, ((0, 0), (0, width - a.shape[1])), constant_values=fill)


def prepare_kernel_params(p):
    """Fuse gates, zero-pad contractions, and reorder/pad MDN output columns into
    128-lane-aligned blocks.  All padding is exact (zero weights / -1e30 pi bias)."""
    # LSTM: fuse the 4 gates along the output dim (order i|f|g|o), pad D to 64.
    wih = jnp.concatenate([p["wih"][k] for k in range(4)], axis=1)       # (D, 4H)
    wih = jnp.pad(wih, ((0, D_PAD - INPUT_DIM), (0, 0)))                 # (64, 128)
    whh = jnp.concatenate([p["whh"][k] for k in range(4)], axis=1)       # (32, 128)
    b_lstm = jnp.concatenate([p["b_lstm"][k] for k in range(4)], axis=1)  # (1, 128)

    # MDN hidden layers padded to 128 lanes (zero pad rows/cols => exact).
    w1 = _pad_cols(p["w1"], MDN_PAD)                                     # (32, 128)
    b1 = _pad_cols(p["b1"], MDN_PAD)                                     # (1, 128)
    w2 = jnp.pad(p["w2"], ((0, MDN_PAD - MDN_H1), (0, MDN_PAD - MDN_H2)))  # (128, 128)
    b2 = _pad_cols(p["b2"], MDN_PAD)                                     # (1, 128)

    # MDN output layer: reorder columns [pi(5) | var(160) | mean(160)] into
    # 128-aligned blocks [pi|pad 128][var|pad 256][mean|pad 256] = 640 lanes.
    G, GO = NBR_GAUSS, NBR_GAUSS * OUT_DIM
    w3, b3 = p["w3"], p["b3"]
    w3p = jnp.concatenate([_pad_cols(w3[:, :G], COEFF_BLK),
                           _pad_cols(w3[:, G:G + GO], VAR_BLK),
                           _pad_cols(w3[:, G + GO:], MEAN_BLK)], axis=1)  # (100, 640)
    w3p = jnp.pad(w3p, ((0, MDN_PAD - MDN_H2), (0, 0)))                   # (128, 640)
    b3p = jnp.concatenate([_pad_cols(b3[:, :G], COEFF_BLK, fill=NEG_BIG),
                           _pad_cols(b3[:, G:G + GO], VAR_BLK),
                           _pad_cols(b3[:, G + GO:], MEAN_BLK)], axis=1)  # (1, 640)

    return dict(wih=wih, whh=whh, b_lstm=b_lstm,
                w1=w1, b1=b1, w2=w2, b2=b2, w3=w3p, b3=b3p)


# =============================== pure-JAX reference ============================
def reference_forward(x_btd, p):
    B, T, _ = x_btd.shape
    h = jnp.zeros((B, LSTM_UNITS), jnp.float32)
    c = jnp.zeros((B, LSTM_UNITS), jnp.float32)
    outs = []
    for t in range(T):
        xt = x_btd[:, t]
        i = jax.nn.sigmoid(xt @ p["wih"][0] + h @ p["whh"][0] + p["b_lstm"][0])
        f = jax.nn.sigmoid(xt @ p["wih"][1] + h @ p["whh"][1] + p["b_lstm"][1])
        g = jnp.tanh(xt @ p["wih"][2] + h @ p["whh"][2] + p["b_lstm"][2])
        o = jax.nn.sigmoid(xt @ p["wih"][3] + h @ p["whh"][3] + p["b_lstm"][3])
        c = f * c + i * g
        h = o * jnp.tanh(c)
        outs.append(h)
    out = jnp.stack(outs, axis=1).reshape(B * T, LSTM_UNITS)
    hdn = jnp.maximum(out @ p["w1"] + p["b1"], 0.0)
    hdn = jnp.maximum(hdn @ p["w2"] + p["b2"], 0.0)
    h3 = hdn @ p["w3"] + p["b3"]
    coeff = jax.nn.softmax(h3[:, :NBR_GAUSS] / TEMP, axis=1)
    var = jnp.exp(h3[:, NBR_GAUSS:NBR_GAUSS + NBR_GAUSS * OUT_DIM]) * TEMP
    mean = h3[:, NBR_GAUSS + NBR_GAUSS * OUT_DIM:]
    return (coeff.reshape(B, T, NBR_GAUSS),
            mean.reshape(B, T, NBR_GAUSS, OUT_DIM),
            var.reshape(B, T, NBR_GAUSS, OUT_DIM))


# ===================================== main ====================================
if __name__ == "__main__":
    key = jax.random.PRNGKey(0)
    k_par, k_x = jax.random.split(key)
    params = init_params(k_par)
    kparams = prepare_kernel_params(params)
    x = jax.random.normal(k_x, (BATCH, SEQ, INPUT_DIM), jnp.float32)

    fwd = jax.jit(mdn_rnn_forward)
    coeff, mean, var = fwd(x, kparams)
    jax.block_until_ready((coeff, mean, var))

    coeff_r, mean_r, var_r = reference_forward(x, params)
    assert coeff.shape == (BATCH, SEQ, NBR_GAUSS)
    assert mean.shape == (BATCH, SEQ, NBR_GAUSS, OUT_DIM)
    assert var.shape == (BATCH, SEQ, NBR_GAUSS, OUT_DIM)
    assert jnp.allclose(coeff, coeff_r, rtol=1e-5, atol=1e-5)
    assert jnp.allclose(mean, mean_r, rtol=1e-5, atol=1e-5)
    assert jnp.allclose(var, var_r, rtol=1e-4, atol=1e-4)

    print("KERNEL_OK")
</pallas_src>

<mosaic_0001>
module attributes {stable_mosaic.version = 11 : i64} {
  func.func @mdn_rnn_kernel(%arg0: memref<16x64xf32, #tpu.memory_space<vmem>>, %arg1: memref<64x128xf32, #tpu.memory_space<vmem>>, %arg2: memref<32x128xf32, #tpu.memory_space<vmem>>, %arg3: memref<1x128xf32, #tpu.memory_space<vmem>>, %arg4: memref<32x128xf32, #tpu.memory_space<vmem>>, %arg5: memref<1x128xf32, #tpu.memory_space<vmem>>, %arg6: memref<128x128xf32, #tpu.memory_space<vmem>>, %arg7: memref<1x128xf32, #tpu.memory_space<vmem>>, %arg8: memref<128x640xf32, #tpu.memory_space<vmem>>, %arg9: memref<1x640xf32, #tpu.memory_space<vmem>>, %arg10: memref<16x640xf32, #tpu.memory_space<vmem>>) attributes {dimension_semantics = [], scalar_prefetch = 0 : i64, scratch_operands = 0 : i64, tpu.core_type = #tpu.core_type<tc>} {
    %c0 = arith.constant 0 : index
    %c0_0 = arith.constant 0 : index
    %0 = vector.load %arg0[%c0, %c0_0] : memref<16x64xf32, #tpu.memory_space<vmem>>, vector<16x64xf32>
    %c0_1 = arith.constant 0 : index
    %c0_2 = arith.constant 0 : index
    %1 = vector.load %arg1[%c0_1, %c0_2] : memref<64x128xf32, #tpu.memory_space<vmem>>, vector<64x128xf32>
    %cst = arith.constant dense<0.000000e+00> : vector<16x128xf32>
    %2 = tpu.matmul %0, %1, %cst {dimension_numbers = #tpu.dot_dimension_numbers<[1], [0], [0], [1], [0, 0, 1, 1], [], []>} : vector<16x64xf32>, vector<64x128xf32>, vector<16x128xf32> -> vector<16x128xf32>
    %c0_3 = arith.constant 0 : index
    %c0_4 = arith.constant 0 : index
    %3 = vector.load %arg3[%c0_3, %c0_4] : memref<1x128xf32, #tpu.memory_space<vmem>>, vector<1x128xf32>
    %4 = vector.broadcast %3 : vector<1x128xf32> to vector<16x128xf32>
    %5 = arith.addf %2, %4 : vector<16x128xf32>
    %c0_5 = arith.constant 0 : index
    %c0_6 = arith.constant 0 : index
    %6 = vector.load %arg2[%c0_5, %c0_6] : memref<32x128xf32, #tpu.memory_space<vmem>>, vector<32x128xf32>
    %cst_7 = arith.constant 0.000000e+00 : f32
    %7 = vector.broadcast %cst_7 : f32 to vector<2x32xf32>
    %cst_8 = arith.constant 0.000000e+00 : f32
    %8 = vector.broadcast %cst_8 : f32 to vector<2x32xf32>
    %9 = vector.extract_strided_slice %5 {offsets = [0, 0], sizes = [2, 128], strides = [1, 1]} : vector<16x128xf32> to vector<2x128xf32>
    %cst_9 = arith.constant dense<0.000000e+00> : vector<2x128xf32>
    %10 = tpu.matmul %7, %6, %cst_9 {dimension_numbers = #tpu.dot_dimension_numbers<[1], [0], [0], [1], [0, 0, 1, 1], [], []>} : vector<2x32xf32>, vector<32x128xf32>, vector<2x128xf32> -> vector<2x128xf32>
    %11 = arith.addf %9, %10 : vector<2x128xf32>
    %12 = arith.negf %11 : vector<2x128xf32>
    %13 = math.exp %12 : vector<2x128xf32>
    %cst_10 = arith.constant 1.000000e+00 : f32
    %14 = vector.broadcast %cst_10 : f32 to vector<2x128xf32>
    %15 = arith.addf %14, %13 : vector<2x128xf32>
    %16 = arith.divf %14, %15 : vector<2x128xf32>
    %17 = math.tanh %11 : vector<2x128xf32>
    %18 = vector.extract_strided_slice %16 {offsets = [0, 0], sizes = [2, 32], strides = [1, 1]} : vector<2x128xf32> to vector<2x32xf32>
    %19 = vector.extract_strided_slice %16 {offsets = [0, 32], sizes = [2, 32], strides = [1, 1]} : vector<2x128xf32> to vector<2x32xf32>
    %20 = vector.extract_strided_slice %17 {offsets = [0, 64], sizes = [2, 32], strides = [1, 1]} : vector<2x128xf32> to vector<2x32xf32>
    %21 = vector.extract_strided_slice %16 {offsets = [0, 96], sizes = [2, 32], strides = [1, 1]} : vector<2x128xf32> to vector<2x32xf32>
    %22 = arith.mulf %19, %8 : vector<2x32xf32>
    %23 = arith.mulf %18, %20 : vector<2x32xf32>
    %24 = arith.addf %22, %23 : vector<2x32xf32>
    %25 = math.tanh %24 : vector<2x32xf32>
    %26 = arith.mulf %21, %25 : vector<2x32xf32>
    %27 = vector.extract_strided_slice %5 {offsets = [2, 0], sizes = [2, 128], strides = [1, 1]} : vector<16x128xf32> to vector<2x128xf32>
    %cst_11 = arith.constant dense<0.000000e+00> : vector<2x128xf32>
    %28 = tpu.matmul %26, %6, %cst_11 {dimension_numbers = #tpu.dot_dimension_numbers<[1], [0], [0], [1], [0, 0, 1, 1], [], []>} : vector<2x32xf32>, vector<32x128xf32>, vector<2x128xf32> -> vector<2x128xf32>
    %29 = arith.addf %27, %28 : vector<2x128xf32>
    %30 = arith.negf %29 : vector<2x128xf32>
    %31 = math.exp %30 : vector<2x128xf32>
    %cst_12 = arith.constant 1.000000e+00 : f32
    %32 = vector.broadcast %cst_12 : f32 to vector<2x128xf32>
    %33 = arith.addf %32, %31 : vector<2x128xf32>
    %34 = arith.divf %32, %33 : vector<2x128xf32>
    %35 = math.tanh %29 : vector<2x128xf32>
    %36 = vector.extract_strided_slice %34 {offsets = [0, 0], sizes = [2, 32], strides = [1, 1]} : vector<2x128xf32> to vector<2x32xf32>
    %37 = vector.extract_strided_slice %34 {offsets = [0, 32], sizes = [2, 32], strides = [1, 1]} : vector<2x128xf32> to vector<2x32xf32>
    %38 = vector.extract_strided_slice %35 {offsets = [0, 64], sizes = [2, 32], strides = [1, 1]} : vector<2x128xf32> to vector<2x32xf32>
    %39 = vector.extract_strided_slice %34 {offsets = [0, 96], sizes = [2, 32], strides = [1, 1]} : vector<2x128xf32> to vector<2x32xf32>
    %40 = arith.mulf %37, %24 : vector<2x32xf32>
    %41 = arith.mulf %36, %38 : vector<2x32xf32>
    %42 = arith.addf %40, %41 : vector<2x32xf32>
    %43 = math.tanh %42 : vector<2x32xf32>
    %44 = arith.mulf %39, %43 : vector<2x32xf32>
    %45 = vector.extract_strided_slice %5 {offsets = [4, 0], sizes = [2, 128], strides = [1, 1]} : vector<16x128xf32> to vector<2x128xf32>
    %cst_13 = arith.constant dense<0.000000e+00> : vector<2x128xf32>
    %46 = tpu.matmul %44, %6, %cst_13 {dimension_numbers = #tpu.dot_dimension_numbers<[1], [0], [0], [1], [0, 0, 1, 1], [], []>} : vector<2x32xf32>, vector<32x128xf32>, vector<2x128xf32> -> vector<2x128xf32>
    %47 = arith.addf %45, %46 : vector<2x128xf32>
    %48 = arith.negf %47 : vector<2x128xf32>
    %49 = math.exp %48 : vector<2x128xf32>
    %cst_14 = arith.constant 1.000000e+00 : f32
    %50 = vector.broadcast %cst_14 : f32 to vector<2x128xf32>
    %51 = arith.addf %50, %49 : vector<2x128xf32>
    %52 = arith.divf %50, %51 : vector<2x128xf32>
    %53 = math.tanh %47 : vector<2x128xf32>
    %54 = vector.extract_strided_slice %52 {offsets = [0, 0], sizes = [2, 32], strides = [1, 1]} : vector<2x128xf32> to vector<2x32xf32>
    %55 = vector.extract_strided_slice %52 {offsets = [0, 32], sizes = [2, 32], strides = [1, 1]} : vector<2x128xf32> to vector<2x32xf32>
    %56 = vector.extract_strided_slice %53 {offsets = [0, 64], sizes = [2, 32], strides = [1, 1]} : vector<2x128xf32> to vector<2x32xf32>
    %57 = vector.extract_strided_slice %52 {offsets = [0, 96], sizes = [2, 32], strides = [1, 1]} : vector<2x128xf32> to vector<2x32xf32>
    %58 = arith.mulf %55, %42 : vector<2x32xf32>
    %59 = arith.mulf %54, %56 : vector<2x32xf32>
    %60 = arith.addf %58, %59 : vector<2x32xf32>
    %61 = math.tanh %60 : vector<2x32xf32>
    %62 = arith.mulf %57, %61 : vector<2x32xf32>
    %63 = vector.extract_strided_slice %5 {offsets = [6, 0], sizes = [2, 128], strides = [1, 1]} : vector<16x128xf32> to vector<2x128xf32>
    %cst_15 = arith.constant dense<0.000000e+00> : vector<2x128xf32>
    %64 = tpu.matmul %62, %6, %cst_15 {dimension_numbers = #tpu.dot_dimension_numbers<[1], [0], [0], [1], [0, 0, 1, 1], [], []>} : vector<2x32xf32>, vector<32x128xf32>, vector<2x128xf32> -> vector<2x128xf32>
    %65 = arith.addf %63, %64 : vector<2x128xf32>
    %66 = arith.negf %65 : vector<2x128xf32>
    %67 = math.exp %66 : vector<2x128xf32>
    %cst_16 = arith.constant 1.000000e+00 : f32
    %68 = vector.broadcast %cst_16 : f32 to vector<2x128xf32>
    %69 = arith.addf %68, %67 : vector<2x128xf32>
    %70 = arith.divf %68, %69 : vector<2x128xf32>
    %71 = math.tanh %65 : vector<2x128xf32>
    %72 = vector.extract_strided_slice %70 {offsets = [0, 0], sizes = [2, 32], strides = [1, 1]} : vector<2x128xf32> to vector<2x32xf32>
    %73 = vector.extract_strided_slice %70 {offsets = [0, 32], sizes = [2, 32], strides = [1, 1]} : vector<2x128xf32> to vector<2x32xf32>
    %74 = vector.extract_strided_slice %71 {offsets = [0, 64], sizes = [2, 32], strides = [1, 1]} : vector<2x128xf32> to vector<2x32xf32>
    %75 = vector.extract_strided_slice %70 {offsets = [0, 96], sizes = [2, 32], strides = [1, 1]} : vector<2x128xf32> to vector<2x32xf32>
    %76 = arith.mulf %73, %60 : vector<2x32xf32>
    %77 = arith.mulf %72, %74 : vector<2x32xf32>
    %78 = arith.addf %76, %77 : vector<2x32xf32>
    %79 = math.tanh %78 : vector<2x32xf32>
    %80 = arith.mulf %75, %79 : vector<2x32xf32>
    %81 = vector.extract_strided_slice %5 {offsets = [8, 0], sizes = [2, 128], strides = [1, 1]} : vector<16x128xf32> to vector<2x128xf32>
    %cst_17 = arith.constant dense<0.000000e+00> : vector<2x128xf32>
    %82 = tpu.matmul %80, %6, %cst_17 {dimension_numbers = #tpu.dot_dimension_numbers<[1], [0], [0], [1], [0, 0, 1, 1], [], []>} : vector<2x32xf32>, vector<32x128xf32>, vector<2x128xf32> -> vector<2x128xf32>
    %83 = arith.addf %81, %82 : vector<2x128xf32>
    %84 = arith.negf %83 : vector<2x128xf32>
    %85 = math.exp %84 : vector<2x128xf32>
    %cst_18 = arith.constant 1.000000e+00 : f32
    %86 = vector.broadcast %cst_18 : f32 to vector<2x128xf32>
    %87 = arith.addf %86, %85 : vector<2x128xf32>
    %88 = arith.divf %86, %87 : vector<2x128xf32>
    %89 = math.tanh %83 : vector<2x128xf32>
    %90 = vector.extract_strided_slice %88 {offsets = [0, 0], sizes = [2, 32], strides = [1, 1]} : vector<2x128xf32> to vector<2x32xf32>
    %91 = vector.extract_strided_slice %88 {offsets = [0, 32], sizes = [2, 32], strides = [1, 1]} : vector<2x128xf32> to vector<2x32xf32>
    %92 = vector.extract_strided_slice %89 {offsets = [0, 64], sizes = [2, 32], strides = [1, 1]} : vector<2x128xf32> to vector<2x32xf32>
    %93 = vector.extract_strided_slice %88 {offsets = [0, 96], sizes = [2, 32], strides = [1, 1]} : vector<2x128xf32> to vector<2x32xf32>
    %94 = arith.mulf %91, %78 : vector<2x32xf32>
    %95 = arith.mulf %90, %92 : vector<2x32xf32>
    %96 = arith.addf %94, %95 : vector<2x32xf32>
    %97 = math.tanh %96 : vector<2x32xf32>
    %98 = arith.mulf %93, %97 : vector<2x32xf32>
    %99 = vector.extract_strided_slice %5 {offsets = [10, 0], sizes = [2, 128], strides = [1, 1]} : vector<16x128xf32> to vector<2x128xf32>
    %cst_19 = arith.constant dense<0.000000e+00> : vector<2x128xf32>
    %100 = tpu.matmul %98, %6, %cst_19 {dimension_numbers = #tpu.dot_dimension_numbers<[1], [0], [0], [1], [0, 0, 1, 1], [], []>} : vector<2x32xf32>, vector<32x128xf32>, vector<2x128xf32> -> vector<2x128xf32>
    %101 = arith.addf %99, %100 : vector<2x128xf32>
    %102 = arith.negf %101 : vector<2x128xf32>
    %103 = math.exp %102 : vector<2x128xf32>
    %cst_20 = arith.constant 1.000000e+00 : f32
    %104 = vector.broadcast %cst_20 : f32 to vector<2x128xf32>
    %105 = arith.addf %104, %103 : vector<2x128xf32>
    %106 = arith.divf %104, %105 : vector<2x128xf32>
    %107 = math.tanh %101 : vector<2x128xf32>
    %108 = vector.extract_strided_slice %106 {offsets = [0, 0], sizes = [2, 32], strides = [1, 1]} : vector<2x128xf32> to vector<2x32xf32>
    %109 = vector.extract_strided_slice %106 {offsets = [0, 32], sizes = [2, 32], strides = [1, 1]} : vector<2x128xf32> to vector<2x32xf32>
    %110 = vector.extract_strided_slice %107 {offsets = [0, 64], sizes = [2, 32], strides = [1, 1]} : vector<2x128xf32> to vector<2x32xf32>
    %111 = vector.extract_strided_slice %106 {offsets = [0, 96], sizes = [2, 32], strides = [1, 1]} : vector<2x128xf32> to vector<2x32xf32>
    %112 = arith.mulf %109, %96 : vector<2x32xf32>
    %113 = arith.mulf %108, %110 : vector<2x32xf32>
    %114 = arith.addf %112, %113 : vector<2x32xf32>
    %115 = math.tanh %114 : vector<2x32xf32>
    %116 = arith.mulf %111, %115 : vector<2x32xf32>
    %117 = vector.extract_strided_slice %5 {offsets = [12, 0], sizes = [2, 128], strides = [1, 1]} : vector<16x128xf32> to vector<2x128xf32>
    %cst_21 = arith.constant dense<0.000000e+00> : vector<2x128xf32>
    %118 = tpu.matmul %116, %6, %cst_21 {dimension_numbers = #tpu.dot_dimension_numbers<[1], [0], [0], [1], [0, 0, 1, 1], [], []>} : vector<2x32xf32>, vector<32x128xf32>, vector<2x128xf32> -> vector<2x128xf32>
    %119 = arith.addf %117, %118 : vector<2x128xf32>
    %120 = arith.negf %119 : vector<2x128xf32>
    %121 = math.exp %120 : vector<2x128xf32>
    %cst_22 = arith.constant 1.000000e+00 : f32
    %122 = vector.broadcast %cst_22 : f32 to vector<2x128xf32>
    %123 = arith.addf %122, %121 : vector<2x128xf32>
    %124 = arith.divf %122, %123 : vector<2x128xf32>
    %125 = math.tanh %119 : vector<2x128xf32>
    %126 = vector.extract_strided_slice %124 {offsets = [0, 0], sizes = [2, 32], strides = [1, 1]} : vector<2x128xf32> to vector<2x32xf32>
    %127 = vector.extract_strided_slice %124 {offsets = [0, 32], sizes = [2, 32], strides = [1, 1]} : vector<2x128xf32> to vector<2x32xf32>
    %128 = vector.extract_strided_slice %125 {offsets = [0, 64], sizes = [2, 32], strides = [1, 1]} : vector<2x128xf32> to vector<2x32xf32>
    %129 = vector.extract_strided_slice %124 {offsets = [0, 96], sizes = [2, 32], strides = [1, 1]} : vector<2x128xf32> to vector<2x32xf32>
    %130 = arith.mulf %127, %114 : vector<2x32xf32>
    %131 = arith.mulf %126, %128 : vector<2x32xf32>
    %132 = arith.addf %130, %131 : vector<2x32xf32>
    %133 = math.tanh %132 : vector<2x32xf32>
    %134 = arith.mulf %129, %133 : vector<2x32xf32>
    %135 = vector.extract_strided_slice %5 {offsets = [14, 0], sizes = [2, 128], strides = [1, 1]} : vector<16x128xf32> to vector<2x128xf32>
    %cst_23 = arith.constant dense<0.000000e+00> : vector<2x128xf32>
    %136 = tpu.matmul %134, %6, %cst_23 {dimension_numbers = #tpu.dot_dimension_numbers<[1], [0], [0], [1], [0, 0, 1, 1], [], []>} : vector<2x32xf32>, vector<32x128xf32>, vector<2x128xf32> -> vector<2x128xf32>
    %137 = arith.addf %135, %136 : vector<2x128xf32>
    %138 = arith.negf %137 : vector<2x128xf32>
    %139 = math.exp %138 : vector<2x128xf32>
    %cst_24 = arith.constant 1.000000e+00 : f32
    %140 = vector.broadcast %cst_24 : f32 to vector<2x128xf32>
    %141 = arith.addf %140, %139 : vector<2x128xf32>
    %142 = arith.divf %140, %141 : vector<2x128xf32>
    %143 = math.tanh %137 : vector<2x128xf32>
    %144 = vector.extract_strided_slice %142 {offsets = [0, 0], sizes = [2, 32], strides = [1, 1]} : vector<2x128xf32> to vector<2x32xf32>
    %145 = vector.extract_strided_slice %142 {offsets = [0, 32], sizes = [2, 32], strides = [1, 1]} : vector<2x128xf32> to vector<2x32xf32>
    %146 = vector.extract_strided_slice %143 {offsets = [0, 64], sizes = [2, 32], strides = [1, 1]} : vector<2x128xf32> to vector<2x32xf32>
    %147 = vector.extract_strided_slice %142 {offsets = [0, 96], sizes = [2, 32], strides = [1, 1]} : vector<2x128xf32> to vector<2x32xf32>
    %148 = arith.mulf %145, %132 : vector<2x32xf32>
    %149 = arith.mulf %144, %146 : vector<2x32xf32>
    %150 = arith.addf %148, %149 : vector<2x32xf32>
    %151 = math.tanh %150 : vector<2x32xf32>
    %152 = arith.mulf %147, %151 : vector<2x32xf32>
    %153 = tpu.concatenate %26, %44, %62, %80, %98, %116, %134, %152 in 0 : vector<2x32xf32>, vector<2x32xf32>, vector<2x32xf32>, vector<2x32xf32>, vector<2x32xf32>, vector<2x32xf32>, vector<2x32xf32>, vector<2x32xf32> -> vector<16x32xf32>
    %c0_25 = arith.constant 0 : index
    %c0_26 = arith.constant 0 : index
    %154 = vector.load %arg4[%c0_25, %c0_26] : memref<32x128xf32, #tpu.memory_space<vmem>>, vector<32x128xf32>
    %cst_27 = arith.constant dense<0.000000e+00> : vector<16x128xf32>
    %155 = tpu.matmul %153, %154, %cst_27 {dimension_numbers = #tpu.dot_dimension_numbers<[1], [0], [0], [1], [0, 0, 1, 1], [], []>} : vector<16x32xf32>, vector<32x128xf32>, vector<16x128xf32> -> vector<16x128xf32>
    %c0_28 = arith.constant 0 : index
    %c0_29 = arith.constant 0 : index
    %156 = vector.load %arg5[%c0_28, %c0_29] : memref<1x128xf32, #tpu.memory_space<vmem>>, vector<1x128xf32>
    %157 = vector.broadcast %156 : vector<1x128xf32> to vector<16x128xf32>
    %158 = arith.addf %155, %157 : vector<16x128xf32>
    %cst_30 = arith.constant 0.000000e+00 : f32
    %159 = vector.broadcast %cst_30 : f32 to vector<16x128xf32>
    %160 = arith.maximumf %158, %159 : vector<16x128xf32>
    %c0_31 = arith.constant 0 : index
    %c0_32 = arith.constant 0 : index
    %161 = vector.load %arg6[%c0_31, %c0_32] : memref<128x128xf32, #tpu.memory_space<vmem>>, vector<128x128xf32>
    %cst_33 = arith.constant dense<0.000000e+00> : vector<16x128xf32>
    %162 = tpu.matmul %160, %161, %cst_33 {dimension_numbers = #tpu.dot_dimension_numbers<[1], [0], [0], [1], [0, 0, 1, 1], [], []>} : vector<16x128xf32>, vector<128x128xf32>, vector<16x128xf32> -> vector<16x128xf32>
    %c0_34 = arith.constant 0 : index
    %c0_35 = arith.constant 0 : index
    %163 = vector.load %arg7[%c0_34, %c0_35] : memref<1x128xf32, #tpu.memory_space<vmem>>, vector<1x128xf32>
    %164 = vector.broadcast %163 : vector<1x128xf32> to vector<16x128xf32>
    %165 = arith.addf %162, %164 : vector<16x128xf32>
    %cst_36 = arith.constant 0.000000e+00 : f32
    %166 = vector.broadcast %cst_36 : f32 to vector<16x128xf32>
    %167 = arith.maximumf %165, %166 : vector<16x128xf32>
    %c0_37 = arith.constant 0 : index
    %c0_38 = arith.constant 0 : index
    %168 = vector.load %arg8[%c0_37, %c0_38] : memref<128x640xf32, #tpu.memory_space<vmem>>, vector<128x640xf32>
    %cst_39 = arith.constant dense<0.000000e+00> : vector<16x640xf32>
    %169 = tpu.matmul %167, %168, %cst_39 {dimension_numbers = #tpu.dot_dimension_numbers<[1], [0], [0], [1], [0, 0, 1, 1], [], []>} : vector<16x128xf32>, vector<128x640xf32>, vector<16x640xf32> -> vector<16x640xf32>
    %c0_40 = arith.constant 0 : index
    %c0_41 = arith.constant 0 : index
    %170 = vector.load %arg9[%c0_40, %c0_41] : memref<1x640xf32, #tpu.memory_space<vmem>>, vector<1x640xf32>
    %171 = vector.broadcast %170 : vector<1x640xf32> to vector<16x640xf32>
    %172 = arith.addf %169, %171 : vector<16x640xf32>
    %173 = vector.extract_strided_slice %172 {offsets = [0, 0], sizes = [16, 128], strides = [1, 1]} : vector<16x640xf32> to vector<16x128xf32>
    %cst_42 = arith.constant 1.000000e+00 : f32
    %174 = vector.broadcast %cst_42 : f32 to vector<16x128xf32>
    %175 = arith.mulf %173, %174 : vector<16x128xf32>
    %cst_43 = arith.constant dense<0xFF800000> : vector<16xf32>
    %176 = vector.multi_reduction <maximumf>, %175, %cst_43 [1] : vector<16x128xf32> to vector<16xf32>
    %177 = vector.shape_cast %176 : vector<16xf32> to vector<16x1xf32>
    %178 = vector.broadcast %177 : vector<16x1xf32> to vector<16x128xf32>
    %179 = arith.subf %175, %178 : vector<16x128xf32>
    %180 = math.exp %179 : vector<16x128xf32>
    %cst_44 = arith.constant dense<0.000000e+00> : vector<16xf32>
    %181 = vector.multi_reduction <add>, %180, %cst_44 [1] : vector<16x128xf32> to vector<16xf32>
    %182 = vector.shape_cast %181 : vector<16xf32> to vector<16x1xf32>
    %183 = tpu.reciprocal %182 : vector<16x1xf32> -> vector<16x1xf32>
    %184 = vector.broadcast %183 : vector<16x1xf32> to vector<16x128xf32>
    %185 = arith.mulf %180, %184 : vector<16x128xf32>
    %c0_45 = arith.constant 0 : index
    %c0_46 = arith.constant 0 : index
    %186 = vector.load %arg10[%c0_45, %c0_46] : memref<16x640xf32, #tpu.memory_space<vmem>>, vector<16x128xf32>
    tpu.vector_store %arg10[%c0_45, %c0_46], %185 {strides = array<i32>} : memref<16x640xf32, #tpu.memory_space<vmem>>, vector<16x128xf32>,
    %187 = vector.extract_strided_slice %172 {offsets = [0, 128], sizes = [16, 256], strides = [1, 1]} : vector<16x640xf32> to vector<16x256xf32>
    %188 = math.exp %187 : vector<16x256xf32>
    %cst_47 = arith.constant 1.000000e+00 : f32
    %189 = vector.broadcast %cst_47 : f32 to vector<16x256xf32>
    %190 = arith.mulf %188, %189 : vector<16x256xf32>
    %c0_48 = arith.constant 0 : index
    %c128 = arith.constant 128 : index
    %191 = vector.load %arg10[%c0_48, %c128] : memref<16x640xf32, #tpu.memory_space<vmem>>, vector<16x256xf32>
    tpu.vector_store %arg10[%c0_48, %c128], %190 {strides = array<i32>} : memref<16x640xf32, #tpu.memory_space<vmem>>, vector<16x256xf32>,
    %192 = vector.extract_strided_slice %172 {offsets = [0, 384], sizes = [16, 256], strides = [1, 1]} : vector<16x640xf32> to vector<16x256xf32>
    %c0_49 = arith.constant 0 : index
    %c384 = arith.constant 384 : index
    %193 = vector.load %arg10[%c0_49, %c384] : memref<16x640xf32, #tpu.memory_space<vmem>>, vector<16x256xf32>
    tpu.vector_store %arg10[%c0_49, %c384], %192 {strides = array<i32>} : memref<16x640xf32, #tpu.memory_space<vmem>>, vector<16x256xf32>,
    return
  }
}

</mosaic_0001>

<bundles_post_ra>
// kernel: mdn_rnn_forward.1
= control target key start
LH: loop header
LB: loop body
LE: loop exit
PB: predicated region body
PF: predicated region fallthrough
CT: control target
= control target key end

     0   :  { %15 = vsyncpa [#allocation3], 0  ;;  %s2595_s0 = inlined_call_operand.vmem [shape: f32[16,64], index: 0, kind: input, shape index: {}]   ;;  %s2596_s1 = inlined_call_operand.vmem [shape: f32[64,128], index: 1, kind: input, shape index: {}]   ;;  %s2597_s2 = inlined_call_operand.vmem [shape: f32[32,128], index: 2, kind: input, shape index: {}]   ;;  %s2598_s3 = inlined_call_operand.vmem [shape: f32[1,128], index: 3, kind: input, shape index: {}]   ;;  %s2599_s4 = inlined_call_operand.hbm [shape: f32[32,128], index: 4, kind: input, shape index: {}]   ;;  %s2600_s5 = inlined_call_operand.vmem [shape: f32[1,128], index: 5, kind: input, shape index: {}]   ;;  %s2601_s6 = inlined_call_operand.hbm [shape: f32[128,128], index: 6, kind: input, shape index: {}]   ;;  %s2602_s7 = inlined_call_operand.vmem [shape: f32[1,128], index: 7, kind: input, shape index: {}]   ;;  %s2603_s8 = inlined_call_operand.hbm [shape: f32[128,640], index: 8, kind: input, shape index: {}]   ;;  %s2604_s9 = inlined_call_operand.vmem [shape: f32[1,640], index: 9, kind: input, shape index: {}]   ;;  %s2605_s10 = inlined_call_operand.vmem [shape: f32[16,640], index: 10, kind: output, shape index: {}]  }
   0x1   :  { %16 = vsyncpa [#allocation5], 0  ;;  %s2271_s13 = smov [#allocation4]   ;;  %s2272_s15 = smov [#allocation2]  }
   0x2   :  { %s44_s14 = sshll.u32 %s2271_s13, 4  ;;  %s30_s16 = sshll.u32 %s2272_s15, 4  ;;  %s45_s14 = int_to_ptr.vmem [resolvable:$true] %s44_s14  ;;  %s2338_s16 = int_to_ptr.vmem [resolvable:$true] %s30_s16 }
   0x3   :  { %s2201_s19 = scalar_lea.hbm %s2601_s6, 2048 }
   0x4   :  { %p2202_p0 = scmp.ne.s32.totalorder %s2601_s6, %s2201_s19  ;;  %p2205_p1 = scmp.lt.u32.totalorder %s2201_s19, %s2601_s6 }
   0x6   :  { %p2207_p2 = pnand %p2205_p1, %p2202_p0 }
   0x8   :  { %2210 = shalt.err (!%p2207_p2)
}
   0x9   :  { %s2211_s24 = scalar_lea.vmem %s45_s14, 2048  ;;  %p2216_p4 = scmp.lt.s32.totalorder %s45_s14, %s45_s14 }
   0xa   :  { %p2212_p3 = scmp.ne.s32.totalorder %s45_s14, %s2211_s24  ;;  %p2217_p5 = scmp.lt.s32.totalorder %s2211_s24, %s2211_s24 }
   0xc   :  { %p2218_p6 = por %p2217_p5, %p2216_p4 }
   0xe   :  { %p2219_p7 = pnand %p2218_p6, %p2212_p3 }
  0x10   :  { %2222 = shalt.err (!%p2219_p7)
}
  0x11   :  { %s2273_s25 = smov 128   ;;  %s2274_s26 = smov 8  }
  0x12   :  { %50 = dma.hbm_to_vmem [thread:$0]  %s2601_s6, 2048, %s45_s14, [#allocation5], %s2273_s25, %s2273_s25, %s2274_s26  }
  0x13   :  { %s2223_s11 = scalar_lea.hbm %s2599_s4, 512 }
  0x14   :  { %p2224_p8 = scmp.ne.s32.totalorder %s2599_s4, %s2223_s11  ;;  %p2227_p9 = scmp.lt.u32.totalorder %s2223_s11, %s2599_s4 }
  0x16   :  { %p2229_p10 = pnand %p2227_p9, %p2224_p8 }
  0x18   :  { %2232 = shalt.err (!%p2229_p10)
}
  0x19   :  { %s2233_s18 = scalar_lea.vmem %s2338_s16, 512  ;;  %p2238_p12 = scmp.lt.s32.totalorder %s2338_s16, %s2338_s16 }
  0x1a   :  { %p2234_p11 = scmp.ne.s32.totalorder %s2338_s16, %s2233_s18  ;;  %p2239_p13 = scmp.lt.s32.totalorder %s2233_s18, %s2233_s18 }
  0x1c   :  { %p2240_p0 = por %p2239_p13, %p2238_p12 }
  0x1e   :  { %p2241_p1 = pnand %p2240_p0, %p2234_p11 }
  0x20   :  { %2244 = shalt.err (!%p2241_p1)
}
  0x21   :  { %36 = dma.hbm_to_vmem [thread:$0]  %s2599_s4, 512, %s2338_s16, [#allocation3], %s2273_s25, %s2273_s25, %s2274_s26  }
  0x22   :  { %s2275_s19 = smov [#allocation6]   ;;  %s2245_s23 = scalar_lea.hbm %s2603_s8, 10240 }
  0x23   :  { %s58_s20 = sshll.u32 %s2275_s19, 4  ;;  %p2246_p2 = scmp.ne.s32.totalorder %s2603_s8, %s2245_s23  ;;  %s59_s20 = int_to_ptr.vmem [resolvable:$true] %s58_s20 }
  0x24   :  { %p2249_p3 = scmp.lt.u32.totalorder %s2245_s23, %s2603_s8 }
  0x26   :  { %p2251_p4 = pnand %p2249_p3, %p2246_p2 }
  0x28   :  { %2254 = shalt.err (!%p2251_p4)
}
  0x29   :  { %s2255_s30 = scalar_lea.vmem %s59_s20, 10240  ;;  %p2260_p6 = scmp.lt.s32.totalorder %s59_s20, %s59_s20 }
  0x2a   :  { %p2256_p5 = scmp.ne.s32.totalorder %s59_s20, %s2255_s30  ;;  %p2261_p7 = scmp.lt.s32.totalorder %s2255_s30, %s2255_s30 }
  0x2c   :  { %p2262_p8 = por %p2261_p7, %p2260_p6 }
  0x2e   :  { %p2263_p9 = pnand %p2262_p8, %p2256_p5 }
  0x30   :  { %2266 = shalt.err (!%p2263_p9)
}
  0x31   :  { %s2276_s4 = smov 640   ;;  %s2277_s16 = smov 40  }
  0x32   :  { %64 = dma.hbm_to_vmem [thread:$0]  %s2603_s8, 10240, %s59_s20, [#allocation5], %s2276_s4, %s2276_s4, %s2277_s16  }
  0x33   :  { %2267 = dma.done.wait [#allocation3], 512  }
  0x34   :  { %2268 = vsyncadd [#allocation3], 4294966784 }
  0x35   :  { %2269 = dma.done.wait [#allocation5], 12288  }
  0x36   :  { %2270 = vsyncadd [#allocation5], 4294955008  ;;  %v2278_v0 = vmov 0.0|0.0   ;;  %vm2279_vm0 = vmmov 0   ;;  %v2280_v1 = vmov 0.0   ;;  %v78_v2 = vld [vmem:[%s2596_s1] sm:$0xff] }
  0x37   :  { %1925 = vmatprep.subr.bf16.mxu1 %v2278_v0  ;;  %1748 = vmatprep.mubr.msk.f32.mxu1 %vm2279_vm0, %v2280_v1  ;;  %v79_v3 = vld [vmem:[%s2596_s1 + $0x8] sm:$0xff]  ;;  %v80_v4 = vld [vmem:[%s2596_s1 + $0x10] sm:$0xff]  ;;  %v81_v6 = vld [vmem:[%s2596_s1 + $0x18] sm:$0xff]  ;;  %vm93_vm1 = vcmask 523264   ;;  %s2281_s8 = smov 64   ;;  %vm179_vm2 = vcmask 261120  }
  0x38   :  { %v1909_v5 = vpack.c.bf16 %v79_v3, %v78_v2  ;;  %v82_v7 = vld [vmem:[%s2596_s1 + $0x20] sm:$0xff]  ;;  %v1913_v8 = vpack.c.bf16 %v81_v6, %v80_v4  ;;  %v83_v9 = vld [vmem:[%s2596_s1 + $0x28] sm:$0xff]  ;;  %v177_v14 = vld [vmem:[%s2597_s2 + $0x10] sm:$0xff]  ;;  %vm1022_vm3 = vcmask 1041408   ;;  %vm1024_vm4 = vcmask 1043456  }
  0x39   :  { %v175_v10 = vld [vmem:[%s2597_s2] sm:$0xff]  ;;  %v176_v11 = vld [vmem:[%s2597_s2 + $0x8] sm:$0xff]  ;;  %v178_v15 = vld [vmem:[%s2597_s2 + $0x18] sm:$0xff]  ;;  %v1917_v16 = vpack.c.bf16 %v83_v9, %v82_v7  ;;  %vm1026_vm5 = vcmask 1045504  }
  0x3a   :  { %1910 = vmatprep.subr.bf16.mxu0 %v1909_v5  ;;  %v2408_v12 = vpack.c.bf16 %v176_v11, %v175_v10  ;;  %v76_v13 = vld [vmem:[%s2595_s0] sm:$0xff]  ;;  %v2421_v17 = vpack.c.bf16 %v178_v15, %v177_v14  ;;  %v84_v18 = vld [vmem:[%s2596_s1 + $0x30] sm:$0xff]  ;;  %v85_v19 = vld [vmem:[%s2596_s1 + $0x38] sm:$0xff] }
  0x3b   :  { %1912 = vmatpush3.bf16.msra.mxu0 %v1909_v5  ;;  %1737 = vmatprep.mubr.msk.f32.mxu0 %vm93_vm1, %v76_v13  ;;  %v1921_v20 = vpack.c.bf16 %v85_v19, %v84_v18  ;;  %v77_v21 = vld [vmem:[%s2595_s0 + $0x8] sm:$0xff]  ;;  %v1607_v24 = vld [vmem:[%s2598_s3] ss:$0 sm:$0xff]  ;;  %s2282_s3 = smov 32  }
  0x3c   :  { %1914 = vmatprep.subr.bf16.mxu0 %v1913_v8  ;;  %1927 = vmatpush3.bf16.msra.mxu1 %v2408_v12 }
  0x3d   :  { %1928 = vmatprep.subr.bf16.mxu1 %v2278_v0 }
  0x3f   :  { %1916 = vmatpush3.bf16.msra.mxu0 %v1913_v8 }
  0x40   :  { %1918 = vmatprep.subr.bf16.mxu0 %v1917_v16  ;;  %1930 = vmatpush3.bf16.msra.mxu1 %v2421_v17 }
  0x41   :  { %1931 = vmatprep.subr.bf16.mxu1 %v2278_v0 }
  0x43   :  { %1920 = vmatpush3.bf16.msra.mxu0 %v1917_v16  ;;  %1749 = vmatmul.mubr.f32.vlgmr.msra.gmra.mrb[0].mxu1 %v2280_v1 }
  0x44   :  { %1922 = vmatprep.subr.bf16.mxu0 %v1921_v20  ;;  %1933 = vmatpush3.bf16.msra.mxu1 %v2408_v12 }
  0x45   :  { %1934 = vmatprep.subr.bf16.mxu1 %v2278_v0  ;;  %1759 = vmatprep.mubr.msk.f32.mxu1 %vm2279_vm0, %v2280_v1 }
  0x47   :  { %1924 = vmatpush3.bf16.msra.mxu0 %v1921_v20 }
  0x48   :  { %1936 = vmatpush3.bf16.msra.mxu1 %v2421_v17  ;;  %1937 = vmatprep.subr.bf16.mxu0 %v2278_v0 }
  0x49   :  { %1943 = vmatprep.subr.bf16.mxu1 %v2278_v0 }
  0x4a   :  { %1738 = vmatmul.mubr.msk.f32.vlgmr.msra.gmra.mrb[0].mxu0 %vm93_vm1, %v77_v21 }
  0x4b   :  { %1939 = vmatpush3.bf16.msra.mxu0 %v2408_v12  ;;  %1770 = vmatprep.mubr.msk.f32.mxu0 %vm2279_vm0, %v2280_v1 }
  0x4c   :  { %1940 = vmatprep.subr.bf16.mxu0 %v2278_v0 }
  0x4f   :  { %1942 = vmatpush3.bf16.msra.mxu0 %v2421_v17 }
  0x50   :  { %1949 = vmatprep.subr.bf16.mxu0 %v2278_v0 }
 0x116   :  { %v249_v22 = vpop.f32.mrb[0].mxu1 }
 0x117   :  { %v1750_v23 = vpop.f32.mrb[1].mxu1 }
 0x11d   :  { %v1739_v25 = vpop.f32.mrb[0].mxu0 }
 0x11e   :  { %v2453_v26 = vadd.f32 %v1739_v25, %v1607_v24  ;;  %v166_v27 = vpop.f32.mrb[1].mxu0 }
 0x11f   :  { %v2455_v28 = vadd.f32 %v1607_v24, %v166_v27 }
 0x121   :  { %v253_v29 = vadd.f32 %v249_v22, %v2455_v28 }
 0x123   :  { %2121 = vtanh.f32 %v253_v29  ;;  %v1610_v31 = vmul.f32 -1.442695, %v253_v29 }
 0x125   :  { %2123 = vpow2.f32 %v1610_v31 }
 0x12d   :  { %v2122_v30 = vpop.eup %2121 }
 0x12e   :  { %263 = vrot.lane.b32.xlu0 %v2122_v30, %s2281_s8 }
 0x12f   :  { %v2124_v32 = vpop.eup %2123 }
 0x130   :  { %v257_v33 = vadd.f32 1.0, %v2124_v32 }
 0x132   :  { %2125 = vrcp.f32 %v257_v33 }
 0x13c   :  { %v2126_v34 = vpop.eup %2125 }
 0x13d   :  { %v261_v37 = vmul.f32 0.0, %v2126_v34 }
 0x1a0   :  { %v264_v35 = vpop.permute.xlu0 %263 }
 0x1a1   :  { %v266_v36 = vmul.f32 %v2126_v34, %v264_v35 }
 0x1a3   :  { %268 = vrot.lane.b32.xlu0 %v266_v36, %s2282_s3 }
 0x215   :  { %v269_v38 = vpop.permute.xlu0 %268 }
 0x216   :  { %v271_v39 = vadd.f32 %v269_v38, %v261_v37 }
 0x218   :  { %2127 = vtanh.f32 %v271_v39  ;;  %v365_v55 = vrot.slane %v271_v39, 6 }
 0x222   :  { %v2128_v40 = vpop.eup %2127 }
 0x223   :  { %274 = vrot.lane.b32.xlu1 %v2128_v40, %s2281_s8 }
 0x295   :  { %v275_v41 = vpop.permute.xlu1 %274 }
 0x296   :  { %v2461_v42 = vmul.f32 %v2126_v34, %v275_v41 }
 0x298   :  { %279 = vrot.lane.b32.xlu1 %v2461_v42, %s2282_s3 }
 0x30a   :  { %v280_v43 = vpop.permute.xlu1 %279 }
 0x30b   :  { %1760 = vmatmul.mubr.msk.f32.vlgmr.msra.gmra.mrb[2].mxu1 %vm179_vm2, %v280_v43 }
 0x30c   :  { %1945 = vmatpush3.bf16.msra.mxu1 %v2408_v12  ;;  %1781 = vmatprep.mubr.msk.f32.mxu1 %vm2279_vm0, %v2280_v1 }
 0x30d   :  { %1946 = vmatprep.subr.bf16.mxu1 %v2278_v0 }
 0x310   :  { %1948 = vmatpush3.bf16.msra.mxu1 %v2421_v17 }
 0x311   :  { %1955 = vmatprep.subr.bf16.mxu1 %v2278_v0 }
 0x3de   :  { %v349_v44 = vpop.f32.mrb[2].mxu1 }
 0x3df   :  { %v354_v45 = vrot.slane %v349_v44, 6  ;;  %v1761_v46 = vpop.f32.mrb[3].mxu1 }
 0x3e1   :  { %v356_v47 = vadd.f32 %v354_v45, %v2455_v28 }
 0x3e3   :  { %2129 = vtanh.f32 %v356_v47  ;;  %v1612_v49 = vmul.f32 -1.442695, %v356_v47 }
 0x3e5   :  { %2131 = vpow2.f32 %v1612_v49 }
 0x3ed   :  { %v2130_v48 = vpop.eup %2129 }
 0x3ee   :  { %369 = vrot.lane.b32.xlu0 %v2130_v48, %s2281_s8 }
 0x3ef   :  { %v2132_v50 = vpop.eup %2131 }
 0x3f0   :  { %v360_v51 = vadd.f32 1.0, %v2132_v50 }
 0x3f2   :  { %2133 = vrcp.f32 %v360_v51 }
 0x3fc   :  { %v2134_v52 = vpop.eup %2133 }
 0x3fd   :  { %v367_v56 = vmul.f32 %v2134_v52, %v365_v55 }
 0x460   :  { %v370_v53 = vpop.permute.xlu0 %369 }
 0x461   :  { %v372_v54 = vmul.f32 %v2134_v52, %v370_v53 }
 0x463   :  { %374 = vrot.lane.b32.xlu1 %v372_v54, %s2282_s3 }
 0x4d5   :  { %v375_v57 = vpop.permute.xlu1 %374 }
 0x4d6   :  { %v377_v58 = vadd.f32 %v375_v57, %v367_v56 }
 0x4d8   :  { %2135 = vtanh.f32 %v377_v58  ;;  %v472_v14 = vrot.slane %v377_v58, 6 }
 0x4e2   :  { %v2136_v59 = vpop.eup %2135 }
 0x4e3   :  { %380 = vrot.lane.b32.xlu0 %v2136_v59, %s2281_s8 }
 0x555   :  { %v381_v60 = vpop.permute.xlu0 %380 }
 0x556   :  { %v383_v61 = vmul.f32 %v2134_v52, %v381_v60 }
 0x558   :  { %v385_v62 = vrot.slane %v383_v61, 2  ;;  %v1023_v22 = vsel %vm1022_vm3, %v2461_v42, %v383_v61 }
 0x55a   :  { %386 = vrot.lane.b32.xlu1 %v385_v62, %s2282_s3 }
 0x5cc   :  { %v387_v63 = vpop.permute.xlu1 %386 }
 0x5cd   :  { %1771 = vmatmul.mubr.msk.f32.vlgmr.msra.gmra.mrb[2].mxu0 %vm179_vm2, %v387_v63 }
 0x5ce   :  { %1951 = vmatpush3.bf16.msra.mxu0 %v2408_v12  ;;  %1792 = vmatprep.mubr.msk.f32.mxu0 %vm2279_vm0, %v2280_v1 }
 0x5cf   :  { %1952 = vmatprep.subr.bf16.mxu0 %v2278_v0 }
 0x5d2   :  { %1954 = vmatpush3.bf16.msra.mxu0 %v2421_v17 }
 0x5d3   :  { %1961 = vmatprep.subr.bf16.mxu0 %v2278_v0 }
 0x6a0   :  { %v456_v2 = vpop.f32.mrb[2].mxu0 }
 0x6a1   :  { %v461_v3 = vrot.slane %v456_v2, 4  ;;  %v1772_v4 = vpop.f32.mrb[3].mxu0 }
 0x6a3   :  { %v463_v5 = vadd.f32 %v461_v3, %v2455_v28 }
 0x6a5   :  { %2137 = vtanh.f32 %v463_v5  ;;  %v1614_v7 = vmul.f32 -1.442695, %v463_v5 }
 0x6a7   :  { %2139 = vpow2.f32 %v1614_v7 }
 0x6af   :  { %v2138_v6 = vpop.eup %2137 }
 0x6b0   :  { %476 = vrot.lane.b32.xlu0 %v2138_v6, %s2281_s8 }
 0x6b1   :  { %v2140_v8 = vpop.eup %2139 }
 0x6b2   :  { %v467_v9 = vadd.f32 1.0, %v2140_v8 }
 0x6b4   :  { %2141 = vrcp.f32 %v467_v9 }
 0x6be   :  { %v2142_v10 = vpop.eup %2141 }
 0x6bf   :  { %v474_v15 = vmul.f32 %v2142_v10, %v472_v14 }
 0x722   :  { %v477_v11 = vpop.permute.xlu0 %476 }
 0x723   :  { %v479_v13 = vmul.f32 %v2142_v10, %v477_v11 }
 0x725   :  { %481 = vrot.lane.b32.xlu1 %v479_v13, %s2282_s3 }
 0x797   :  { %v482_v16 = vpop.permute.xlu1 %481 }
 0x798   :  { %v484_v18 = vadd.f32 %v482_v16, %v474_v15 }
 0x79a   :  { %2143 = vtanh.f32 %v484_v18  ;;  %v579_v39 = vrot.slane %v484_v18, 6 }
 0x7a4   :  { %v2144_v19 = vpop.eup %2143 }
 0x7a5   :  { %487 = vrot.lane.b32.xlu0 %v2144_v19, %s2281_s8 }
 0x817   :  { %v488_v20 = vpop.permute.xlu0 %487 }
 0x818   :  { %v490_v21 = vmul.f32 %v2142_v10, %v488_v20 }
 0x81a   :  { %v492_v23 = vrot.slane %v490_v21, 4  ;;  %v1025_v24 = vsel %vm1024_vm4, %v1023_v22, %v490_v21 }
 0x81c   :  { %493 = vrot.lane.b32.xlu1 %v492_v23, %s2282_s3 }
 0x88e   :  { %v494_v25 = vpop.permute.xlu1 %493 }
 0x88f   :  { %1782 = vmatmul.mubr.msk.f32.vlgmr.msra.gmra.mrb[4].mxu1 %vm179_vm2, %v494_v25 }
 0x890   :  { %1957 = vmatpush3.bf16.msra.mxu1 %v2408_v12  ;;  %1803 = vmatprep.mubr.msk.f32.mxu1 %vm2279_vm0, %v2280_v1 }
 0x891   :  { %1958 = vmatprep.subr.bf16.mxu1 %v2278_v0 }
 0x894   :  { %1960 = vmatpush3.bf16.msra.mxu1 %v2421_v17 }
 0x895   :  { %1967 = vmatprep.subr.bf16.mxu1 %v2278_v0 }
 0x962   :  { %v563_v27 = vpop.f32.mrb[4].mxu1 }
 0x963   :  { %v568_v29 = vrot.slane %v563_v27, 2  ;;  %v1783_v30 = vpop.f32.mrb[5].mxu1 }
 0x965   :  { %v570_v31 = vadd.f32 %v568_v29, %v2455_v28 }
 0x967   :  { %2145 = vtanh.f32 %v570_v31  ;;  %v1616_v33 = vmul.f32 -1.442695, %v570_v31 }
 0x969   :  { %2147 = vpow2.f32 %v1616_v33 }
 0x971   :  { %v2146_v32 = vpop.eup %2145 }
 0x972   :  { %583 = vrot.lane.b32.xlu0 %v2146_v32, %s2281_s8 }
 0x973   :  { %v2148_v34 = vpop.eup %2147 }
 0x974   :  { %v574_v35 = vadd.f32 1.0, %v2148_v34 }
 0x976   :  { %2149 = vrcp.f32 %v574_v35 }
 0x980   :  { %v2150_v36 = vpop.eup %2149 }
 0x981   :  { %v581_v40 = vmul.f32 %v2150_v36, %v579_v39 }
 0x9e4   :  { %v584_v37 = vpop.permute.xlu0 %583 }
 0x9e5   :  { %v586_v38 = vmul.f32 %v2150_v36, %v584_v37 }
 0x9e7   :  { %588 = vrot.lane.b32.xlu1 %v586_v38, %s2282_s3 }
 0xa59   :  { %v589_v41 = vpop.permute.xlu1 %588 }
 0xa5a   :  { %v591_v42 = vadd.f32 %v589_v41, %v581_v40 }
 0xa5c   :  { %2151 = vtanh.f32 %v591_v42  ;;  %v683_v58 = vrot.slane %v591_v42, 6 }
 0xa66   :  { %v2152_v28 = vpop.eup %2151 }
 0xa67   :  { %594 = vrot.lane.b32.xlu0 %v2152_v28, %s2281_s8 }
 0xad9   :  { %v595_v43 = vpop.permute.xlu0 %594 }
 0xada   :  { %v597_v44 = vmul.f32 %v2150_v36, %v595_v43 }
 0xadc   :  { %v599_v45 = vrot.slane %v597_v44, 6  ;;  %v2504_v46 = vsel %vm1026_vm5, %v1025_v24, %v597_v44 }
 0xade   :  { %600 = vrot.lane.b32.xlu1 %v599_v45, %s2282_s3 }
 0xb50   :  { %v601_v47 = vpop.permute.xlu1 %600 }
 0xb51   :  { %1793 = vmatmul.mubr.msk.f32.vlgmr.msra.gmra.mrb[4].mxu0 %vm179_vm2, %v601_v47 }
 0xb52   :  { %1963 = vmatpush3.bf16.msra.mxu0 %v2408_v12  ;;  %1814 = vmatprep.mubr.msk.f32.mxu0 %vm2279_vm0, %v2280_v1 }
 0xb53   :  { %1964 = vmatprep.subr.bf16.mxu0 %v2278_v0 }
 0xb56   :  { %1966 = vmatpush3.bf16.msra.mxu0 %v2421_v17 }
 0xc24   :  { %v670_v48 = vpop.f32.mrb[4].mxu0 }
 0xc25   :  { %v674_v49 = vadd.f32 %v670_v48, %v2453_v26  ;;  %v1794_v50 = vpop.f32.mrb[5].mxu0 }
 0xc27   :  { %2153 = vtanh.f32 %v674_v49  ;;  %v1618_v52 = vmul.f32 -1.442695, %v674_v49 }
 0xc29   :  { %2155 = vpow2.f32 %v1618_v52 }
 0xc31   :  { %v2154_v51 = vpop.eup %2153 }
 0xc32   :  { %687 = vrot.lane.b32.xlu0 %v2154_v51, %s2281_s8 }
 0xc33   :  { %v2156_v53 = vpop.eup %2155 }
 0xc34   :  { %v678_v54 = vadd.f32 1.0, %v2156_v53 }
 0xc36   :  { %2157 = vrcp.f32 %v678_v54 }
 0xc40   :  { %v2158_v55 = vpop.eup %2157 }
 0xc41   :  { %v685_v59 = vmul.f32 %v2158_v55, %v683_v58 }
 0xca4   :  { %v688_v56 = vpop.permute.xlu0 %687 }
 0xca5   :  { %v690_v57 = vmul.f32 %v2158_v55, %v688_v56 }
 0xca7   :  { %692 = vrot.lane.b32.xlu1 %v690_v57, %s2282_s3 }
 0xd19   :  { %v693_v60 = vpop.permute.xlu1 %692 }
 0xd1a   :  { %v695_v61 = vadd.f32 %v693_v60, %v685_v59 }
 0xd1c   :  { %2159 = vtanh.f32 %v695_v61 }
 0xd26   :  { %v2160_v62 = vpop.eup %2159 }
 0xd27   :  { %698 = vrot.lane.b32.xlu0 %v2160_v62, %s2281_s8  ;;  %v1031_v62 = vld [vmem:[#allocation2] sm:$0xff] }
 0xd99   :  { %v699_v63 = vpop.permute.xlu0 %698 }
 0xd9a   :  { %v2517_v2 = vmul.f32 %v2158_v55, %v699_v63  ;;  %v1032_v63 = vld [vmem:[#allocation2 + $0x8] sm:$0xff] }
 0xd9c   :  { %703 = vrot.lane.b32.xlu1 %v2517_v2, %s2282_s3 }
 0xe0e   :  { %v704_v3 = vpop.permute.xlu1 %703 }
 0xe0f   :  { %1804 = vmatmul.mubr.msk.f32.vlgmr.msra.gmra.mrb[6].mxu1 %vm179_vm2, %v704_v3  ;;  %v1973_v3 = vpack.c.bf16 %v1032_v63, %v1031_v62  ;;  %v1275_v62 = vld [vmem:[#allocation6 + $0x170] sm:$0xff]  ;;  %v1269_v63 = vld [vmem:[#allocation6 + $0x140] sm:$0xff] }
 0xe10   :  { %1969 = vmatpush3.bf16.msra.mxu1 %v2408_v12  ;;  %1825 = vmatprep.mubr.msk.f32.mxu1 %vm2279_vm0, %v2280_v1 }
 0xe11   :  { %1970 = vmatprep.subr.bf16.mxu1 %v2278_v0  ;;  %v789_v0 = vrot.slane %v695_v61, 6  ;;  %1974 = vmatprep.subr.bf16.mxu0 %v1973_v3 }
 0xe14   :  { %1972 = vmatpush3.bf16.msra.mxu1 %v2421_v17 }
 0xee2   :  { %v773_v4 = vpop.f32.mrb[6].mxu1 }
 0xee3   :  { %v778_v5 = vrot.slane %v773_v4, 6  ;;  %v1805_v6 = vpop.f32.mrb[7].mxu1  ;;  %v1034_v4 = vld [vmem:[#allocation2 + $0x18] sm:$0xff] }
 0xee5   :  { %v780_v7 = vadd.f32 %v778_v5, %v2453_v26 }
 0xee7   :  { %2161 = vtanh.f32 %v780_v7  ;;  %v1620_v9 = vmul.f32 -1.442695, %v780_v7  ;;  %v1130_v7 = vld [vmem:[#allocation4 + $0x8] sm:$0xff] }
 0xee9   :  { %2163 = vpow2.f32 %v1620_v9 }
 0xef1   :  { %v2162_v8 = vpop.eup %2161 }
 0xef2   :  { %793 = vrot.lane.b32.xlu0 %v2162_v8, %s2281_s8  ;;  %v1131_v8 = vld [vmem:[#allocation4 + $0x10] sm:$0xff] }
 0xef3   :  { %v2164_v10 = vpop.eup %2163 }
 0xef4   :  { %v784_v12 = vadd.f32 1.0, %v2164_v10  ;;  %v1132_v10 = vld [vmem:[#allocation4 + $0x18] sm:$0xff] }
 0xef6   :  { %2165 = vrcp.f32 %v784_v12  ;;  %v1985_v12 = vpack.c.bf16 %v1132_v10, %v1131_v8  ;;  %v1284_v8 = vld [vmem:[#allocation6 + $0x1b8] sm:$0xff]  ;;  %v1290_v10 = vld [vmem:[#allocation6 + $0x1e8] sm:$0xff] }
 0xf00   :  { %v2166_v11 = vpop.eup %2165 }
 0xf01   :  { %v791_v17 = vmul.f32 %v2166_v11, %v789_v0  ;;  %v1135_v0 = vld [vmem:[#allocation4 + $0x30] sm:$0xff] }
 0xf64   :  { %v794_v13 = vpop.permute.xlu0 %793 }
 0xf65   :  { %v796_v14 = vmul.f32 %v2166_v11, %v794_v13  ;;  %v1134_v13 = vld [vmem:[#allocation4 + $0x28] sm:$0xff] }
 0xf67   :  { %798 = vrot.lane.b32.xlu1 %v796_v14, %s2282_s3 }
 0xfd9   :  { %v799_v15 = vpop.permute.xlu1 %798 }
 0xfda   :  { %v801_v16 = vadd.f32 %v799_v15, %v791_v17  ;;  %v1136_v17 = vld [vmem:[#allocation4 + $0x38] sm:$0xff] }
 0xfdc   :  { %2167 = vtanh.f32 %v801_v16  ;;  %v896_v36 = vrot.slane %v801_v16, 6  ;;  %v1993_v16 = vpack.c.bf16 %v1136_v17, %v1135_v0  ;;  %v1625_v17 = vld [vmem:[%s2600_s5] ss:$0 sm:$0xff] }
 0xfe6   :  { %v2168_v18 = vpop.eup %2167 }
 0xfe7   :  { %804 = vrot.lane.b32.xlu0 %v2168_v18, %s2281_s8 }
0x1059   :  { %v805_v19 = vpop.permute.xlu0 %804 }
0x105a   :  { %v807_v20 = vmul.f32 %v2166_v11, %v805_v19  ;;  %v1133_v11 = vld [vmem:[#allocation4 + $0x20] sm:$0xff] }
0x105b   :  { %v1989_v14 = vpack.c.bf16 %v1134_v13, %v1133_v11  ;;  %v1137_v19 = vld [vmem:[#allocation4 + $0x40] sm:$0xff] }
0x105c   :  { %v809_v21 = vrot.slane %v807_v20, 2  ;;  %v1028_v28 = vsel %vm1022_vm3, %v2517_v2, %v807_v20  ;;  %v1033_v2 = vld [vmem:[#allocation2 + $0x10] sm:$0xff]  ;;  %v1138_v20 = vld [vmem:[#allocation4 + $0x48] sm:$0xff]  ;;  %v1289_v11 = vld [vmem:[#allocation6 + $0x1e0] sm:$0xff] }
0x105d   :  { %v1977_v5 = vpack.c.bf16 %v1034_v4, %v1033_v2 }
0x105e   :  { %810 = vrot.lane.b32.xlu1 %v809_v21, %s2282_s3 }
0x10d0   :  { %v811_v22 = vpop.permute.xlu1 %810 }
0x10d1   :  { %1815 = vmatmul.mubr.msk.f32.vlgmr.msra.gmra.mrb[6].mxu0 %vm179_vm2, %v811_v22  ;;  %v1997_v22 = vpack.c.bf16 %v1138_v20, %v1137_v19  ;;  %v1231_v19 = vld [vmem:[#allocation6 + $0x10] sm:$0xff]  ;;  %v1236_v20 = vld [vmem:[#allocation6 + $0x38] sm:$0xff] }
0x10d2   :  { %1976 = vmatpush3.bf16.msra.mxu0 %v1973_v3  ;;  %v1274_v3 = vld [vmem:[#allocation6 + $0x168] sm:$0xff] }
0x10d3   :  { %1978 = vmatprep.subr.bf16.mxu0 %v1977_v5  ;;  %v2031_v4 = vpack.c.bf16 %v1274_v3, %v1269_v63  ;;  %v1305_v63 = vld [vmem:[#allocation6 + $0x260] sm:$0xff]  ;;  %v1299_v3 = vld [vmem:[#allocation6 + $0x230] sm:$0xff] }
0x10d6   :  { %1980 = vmatpush3.bf16.msra.mxu0 %v1977_v5  ;;  %v1280_v5 = vld [vmem:[#allocation6 + $0x198] sm:$0xff] }
0x11a4   :  { %v880_v23 = vpop.f32.mrb[6].mxu0 }
0x11a5   :  { %v885_v24 = vrot.slane %v880_v23, 4  ;;  %v1816_v25 = vpop.f32.mrb[7].mxu0  ;;  %v1139_v23 = vld [vmem:[#allocation4 + $0x50] sm:$0xff] }
0x11a7   :  { %v887_v27 = vadd.f32 %v885_v24, %v2453_v26  ;;  %v1140_v24 = vld [vmem:[#allocation4 + $0x58] sm:$0xff] }
0x11a8   :  { %v2001_v25 = vpack.c.bf16 %v1140_v24, %v1139_v23  ;;  %v1247_v23 = vld [vmem:[#allocation6 + $0x90] sm:$0xff] }
0x11a9   :  { %2169 = vtanh.f32 %v887_v27  ;;  %v1622_v30 = vmul.f32 -1.442695, %v887_v27  ;;  %v1141_v27 = vld [vmem:[#allocation4 + $0x60] sm:$0xff] }
0x11ab   :  { %2171 = vpow2.f32 %v1622_v30 }
0x11b3   :  { %v2170_v29 = vpop.eup %2169 }
0x11b4   :  { %900 = vrot.lane.b32.xlu0 %v2170_v29, %s2281_s8  ;;  %v1142_v29 = vld [vmem:[#allocation4 + $0x68] sm:$0xff] }
0x11b5   :  { %v2172_v31 = vpop.eup %2171  ;;  %v2005_v30 = vpack.c.bf16 %v1142_v29, %v1141_v27 }
0x11b6   :  { %v891_v32 = vadd.f32 1.0, %v2172_v31 }
0x11b8   :  { %2173 = vrcp.f32 %v891_v32  ;;  %v1143_v32 = vld [vmem:[#allocation4 + $0x70] sm:$0xff] }
0x11c2   :  { %v2174_v33 = vpop.eup %2173 }
0x11c3   :  { %v898_v37 = vmul.f32 %v2174_v33, %v896_v36  ;;  %v1235_v36 = vld [vmem:[#allocation6 + $0x30] sm:$0xff] }
0x1226   :  { %v901_v34 = vpop.permute.xlu0 %900 }
0x1227   :  { %v903_v35 = vmul.f32 %v2174_v33, %v901_v34 }
0x1229   :  { %905 = vrot.lane.b32.xlu1 %v903_v35, %s2282_s3  ;;  %v1230_v35 = vld [vmem:[#allocation6 + $0x8] sm:$0xff] }
0x129b   :  { %v906_v38 = vpop.permute.xlu1 %905 }
0x129c   :  { %v908_v39 = vadd.f32 %v906_v38, %v898_v37  ;;  %v1229_v37 = vld [vmem:[#allocation6] sm:$0xff]  ;;  %v2013_v38 = vpack.c.bf16 %v1235_v36, %v1230_v35  ;;  %v1251_v36 = vld [vmem:[#allocation6 + $0xb0] sm:$0xff] }
0x129e   :  { %2175 = vtanh.f32 %v908_v39  ;;  %v1003_v58 = vrot.slane %v908_v39, 6  ;;  %v1234_v39 = vld [vmem:[#allocation6 + $0x28] sm:$0xff]  ;;  %2014 = vmatprep.subr.bf16.mxu0 %v2013_v38 }
0x129f   :  { %v1262_v38 = vld [vmem:[#allocation6 + $0x108] sm:$0xff] }
0x12a8   :  { %v2176_v40 = vpop.eup %2175 }
0x12a9   :  { %911 = vrot.lane.b32.xlu0 %v2176_v40, %s2281_s8  ;;  %v1232_v40 = vld [vmem:[#allocation6 + $0x18] sm:$0xff] }
0x131b   :  { %v912_v41 = vpop.permute.xlu0 %911 }
0x131c   :  { %v914_v42 = vmul.f32 %v2174_v33, %v912_v41  ;;  %v1144_v33 = vld [vmem:[#allocation4 + $0x78] sm:$0xff]  ;;  %v1237_v41 = vld [vmem:[#allocation6 + $0x40] sm:$0xff] }
0x131d   :  { %v2009_v34 = vpack.c.bf16 %v1144_v33, %v1143_v32  ;;  %v1252_v32 = vld [vmem:[#allocation6 + $0xb8] sm:$0xff]  ;;  %v1257_v33 = vld [vmem:[#allocation6 + $0xe0] sm:$0xff] }
0x131e   :  { %v916_v43 = vrot.slane %v914_v42, 4  ;;  %v1029_v44 = vsel %vm1024_vm4, %v1028_v28, %v914_v42  ;;  %v2015_v42 = vpack.c.bf16 %v1234_v39, %v1229_v37  ;;  %v2045_v28 = vpack.c.bf16 %v1237_v41, %v1232_v40  ;;  %v1256_v37 = vld [vmem:[#allocation6 + $0xd8] sm:$0xff]  ;;  %v1267_v39 = vld [vmem:[#allocation6 + $0x130] sm:$0xff] }
0x131f   :  { %v2053_v35 = vpack.c.bf16 %v1257_v33, %v1252_v32  ;;  %v2055_v40 = vpack.c.bf16 %v1256_v37, %v1251_v36  ;;  %v2057_v41 = vpack.c.bf16 %v1267_v39, %v1262_v38  ;;  %v1278_v32 = vld [vmem:[#allocation6 + $0x188] sm:$0xff]  ;;  %v1293_v36 = vld [vmem:[#allocation6 + $0x200] sm:$0xff]  ;;  %v1303_v39 = vld [vmem:[#allocation6 + $0x250] sm:$0xff] }
0x1320   :  { %917 = vrot.lane.b32.xlu1 %v916_v43, %s2282_s3  ;;  %v1240_v43 = vld [vmem:[#allocation6 + $0x58] sm:$0xff]  ;;  %v1298_v37 = vld [vmem:[#allocation6 + $0x228] sm:$0xff] }
0x1321   :  { %v2101_v38 = vpack.c.bf16 %v1298_v37, %v1293_v36 }
0x1392   :  { %v918_v45 = vpop.permute.xlu1 %917 }
0x1393   :  { %1826 = vmatmul.mubr.msk.f32.vlgmr.msra.gmra.mrb[8].mxu1 %vm179_vm2, %v918_v45  ;;  %v1239_v45 = vld [vmem:[#allocation6 + $0x50] sm:$0xff] }
0x1466   :  { %v987_v47 = vpop.f32.mrb[8].mxu1 }
0x1467   :  { %v992_v48 = vrot.slane %v987_v47, 2  ;;  %v1827_v49 = vpop.f32.mrb[9].mxu1  ;;  %v1244_v47 = vld [vmem:[#allocation6 + $0x78] sm:$0xff] }
0x1468   :  { %v2019_v49 = vpack.c.bf16 %v1244_v47, %v1239_v45 }
0x1469   :  { %v994_v50 = vadd.f32 %v992_v48, %v2453_v26 }
0x146b   :  { %2177 = vtanh.f32 %v994_v50  ;;  %v1624_v52 = vmul.f32 -1.442695, %v994_v50  ;;  %v1250_v50 = vld [vmem:[#allocation6 + $0xa8] sm:$0xff] }
0x146d   :  { %2179 = vpow2.f32 %v1624_v52 }
0x1475   :  { %v2178_v51 = vpop.eup %2177 }
0x1476   :  { %1007 = vrot.lane.b32.xlu0 %v2178_v51, %s2281_s8  ;;  %v1255_v51 = vld [vmem:[#allocation6 + $0xd0] sm:$0xff] }
0x1477   :  { %v2180_v53 = vpop.eup %2179  ;;  %v2021_v52 = vpack.c.bf16 %v1255_v51, %v1250_v50  ;;  %v1282_v50 = vld [vmem:[#allocation6 + $0x1a8] sm:$0xff]  ;;  %v1287_v51 = vld [vmem:[#allocation6 + $0x1d0] sm:$0xff] }
0x1478   :  { %v998_v54 = vadd.f32 1.0, %v2180_v53  ;;  %v1249_v53 = vld [vmem:[#allocation6 + $0xa0] sm:$0xff] }
0x147a   :  { %2181 = vrcp.f32 %v998_v54  ;;  %v1254_v54 = vld [vmem:[#allocation6 + $0xc8] sm:$0xff] }
0x1484   :  { %v2182_v55 = vpop.eup %2181 }
0x1485   :  { %v1005_v59 = vmul.f32 %v2182_v55, %v1003_v58  ;;  %v1259_v58 = vld [vmem:[#allocation6 + $0xf0] sm:$0xff] }
0x14e8   :  { %v1008_v56 = vpop.permute.xlu0 %1007 }
0x14e9   :  { %v1010_v57 = vmul.f32 %v2182_v55, %v1008_v56  ;;  %v1260_v56 = vld [vmem:[#allocation6 + $0xf8] sm:$0xff] }
0x14eb   :  { %1012 = vrot.lane.b32.xlu1 %v1010_v57, %s2282_s3  ;;  %v1265_v57 = vld [vmem:[#allocation6 + $0x120] sm:$0xff] }
0x14ef   :  { %1044 = vrot.lane.b32.xlu1 %v2504_v46, %s2282_s3  ;;  %v1129_v46 = vld [vmem:[#allocation4] sm:$0xff] }
0x14f0   :  { %v1981_v9 = vpack.c.bf16 %v1130_v7, %v1129_v46  ;;  %v1279_v46 = vld [vmem:[#allocation6 + $0x190] sm:$0xff] }
0x14f2   :  { %1982 = vmatprep.subr.bf16.mxu1 %v1981_v9 }
0x14f3   :  { %1984 = vmatpush3.bf16.msra.mxu1 %v1981_v9  ;;  %v2035_v9 = vpack.c.bf16 %v1284_v8, %v1279_v46  ;;  %v1307_v46 = vld [vmem:[#allocation6 + $0x270] sm:$0xff] }
0x14f4   :  { %1986 = vmatprep.subr.bf16.mxu1 %v1985_v12 }
0x14f7   :  { %1988 = vmatpush3.bf16.msra.mxu1 %v1985_v12  ;;  %v1295_v12 = vld [vmem:[#allocation6 + $0x210] sm:$0xff] }
0x14f8   :  { %1990 = vmatprep.subr.bf16.mxu1 %v1989_v14  ;;  %v2037_v13 = vpack.c.bf16 %v1295_v12, %v1290_v10  ;;  %v1233_v12 = vld [vmem:[#allocation6 + $0x20] sm:$0xff] }
0x14fb   :  { %1992 = vmatpush3.bf16.msra.mxu1 %v1989_v14  ;;  %v1294_v14 = vld [vmem:[#allocation6 + $0x208] sm:$0xff] }
0x14fc   :  { %1994 = vmatprep.subr.bf16.mxu1 %v1993_v16  ;;  %v2039_v0 = vpack.c.bf16 %v1294_v14, %v1289_v11  ;;  %v1238_v11 = vld [vmem:[#allocation6 + $0x48] sm:$0xff]  ;;  %v1628_v14 = vld [vmem:[%s2602_s7] ss:$0 sm:$0xff] }
0x14ff   :  { %1996 = vmatpush3.bf16.msra.mxu1 %v1993_v16 }
0x1500   :  { %1998 = vmatprep.subr.bf16.mxu1 %v1997_v22 }
0x1503   :  { %2000 = vmatpush3.bf16.msra.mxu1 %v1997_v22  ;;  %v1242_v22 = vld [vmem:[#allocation6 + $0x68] sm:$0xff] }
0x1504   :  { %2002 = vmatprep.subr.bf16.mxu1 %v2001_v25  ;;  %v2049_v29 = vpack.c.bf16 %v1247_v23, %v1242_v22  ;;  %v1253_v22 = vld [vmem:[#allocation6 + $0xc0] sm:$0xff]  ;;  %v1258_v23 = vld [vmem:[#allocation6 + $0xe8] sm:$0xff] }
0x1507   :  { %2004 = vmatpush3.bf16.msra.mxu1 %v2001_v25  ;;  %v2047_v25 = vpack.c.bf16 %v1236_v20, %v1231_v19 }
0x1508   :  { %2006 = vmatprep.subr.bf16.mxu1 %v2005_v30 }
0x150b   :  { %2008 = vmatpush3.bf16.msra.mxu1 %v2005_v30  ;;  %v1241_v30 = vld [vmem:[#allocation6 + $0x60] sm:$0xff] }
0x150c   :  { %2010 = vmatprep.subr.bf16.mxu1 %v2009_v34 }
0x150f   :  { %2012 = vmatpush3.bf16.msra.mxu1 %v2009_v34 }
0x1510   :  { %2046 = vmatprep.subr.bf16.mxu1 %v2045_v28  ;;  %v1266_v28 = vld [vmem:[#allocation6 + $0x128] sm:$0xff] }
0x155d   :  { %v1013_v26 = vpop.permute.xlu1 %1012 }
0x155e   :  { %v1015_v60 = vadd.f32 %v1013_v26, %v1005_v59  ;;  %v2025_v59 = vpack.c.bf16 %v1265_v57, %v1260_v56  ;;  %v1264_v26 = vld [vmem:[#allocation6 + $0x118] sm:$0xff]  ;;  %v1297_v57 = vld [vmem:[#allocation6 + $0x220] sm:$0xff] }
0x155f   :  { %v1292_v56 = vld [vmem:[#allocation6 + $0x1f8] sm:$0xff] }
0x1560   :  { %2183 = vtanh.f32 %v1015_v60  ;;  %v2027_v60 = vpack.c.bf16 %v1264_v26, %v1259_v58  ;;  %v1291_v26 = vld [vmem:[#allocation6 + $0x1f0] sm:$0xff] }
0x1561   :  { %v1045_v61 = vpop.permute.xlu1 %1044 }
0x1562   :  { %1836 = vmatprep.mubr.msk.f32.mxu0 %vm179_vm2, %v1045_v61  ;;  %v1270_v61 = vld [vmem:[#allocation6 + $0x148] sm:$0xff] }
0x1563   :  { %v2029_v2 = vpack.c.bf16 %v1275_v62, %v1270_v61  ;;  %v1300_v62 = vld [vmem:[#allocation6 + $0x238] sm:$0xff] }
0x156a   :  { %v2184_v6 = vpop.eup %2183 }
0x156b   :  { %1018 = vrot.lane.b32.xlu0 %v2184_v6, %s2281_s8  ;;  %v1285_v6 = vld [vmem:[#allocation6 + $0x1c0] sm:$0xff] }
0x156c   :  { %v2033_v7 = vpack.c.bf16 %v1285_v6, %v1280_v5  ;;  %v1302_v5 = vld [vmem:[#allocation6 + $0x248] sm:$0xff] }
0x156d   :  { %v2073_v8 = vpack.c.bf16 %v1307_v46, %v1302_v5 }
0x15dd   :  { %v1019_v15 = vpop.permute.xlu0 %1018 }
0x15de   :  { %v1021_v18 = vmul.f32 %v2182_v55, %v1019_v15  ;;  %v2023_v55 = vpack.c.bf16 %v1254_v54, %v1249_v53  ;;  %v2065_v53 = vpack.c.bf16 %v1287_v51, %v1282_v50  ;;  %v1281_v54 = vld [vmem:[#allocation6 + $0x1a0] sm:$0xff] }
0x15e0   :  { %v1030_v21 = vsel %vm1026_vm5, %v1029_v44, %v1021_v18  ;;  %v1245_v44 = vld [vmem:[#allocation6 + $0x80] sm:$0xff] }
0x15e1   :  { %1046 = vrot.lane.b32.xlu0 %v1030_v21, %s2282_s3  ;;  %v2017_v48 = vpack.c.bf16 %v1245_v44, %v1240_v43  ;;  %v1272_v43 = vld [vmem:[#allocation6 + $0x158] sm:$0xff]  ;;  %v1277_v44 = vld [vmem:[#allocation6 + $0x180] sm:$0xff] }
0x15e2   :  { %v2061_v47 = vpack.c.bf16 %v1277_v44, %v1272_v43 }
0x1653   :  { %v1047_v31 = vpop.permute.xlu0 %1046 }
0x1654   :  { %1837 = vmatmul.mubr.msk.f32.vlgmr.msra.gmra.mrb[8].mxu0 %vm179_vm2, %v1047_v31  ;;  %v1246_v31 = vld [vmem:[#allocation6 + $0x88] sm:$0xff] }
0x1655   :  { %1400 = vmatprep.mubr.f32.mxu0 %v2280_v1  ;;  %2016 = vmatpush1.bf16.msra.mxu0 %v2015_v42  ;;  %v2051_v34 = vpack.c.bf16 %v1246_v31, %v1241_v30  ;;  %v1261_v42 = vld [vmem:[#allocation6 + $0x100] sm:$0xff] }
0x1656   :  { %2018 = vmatprep.subr.bf16.mxu0 %v2017_v48  ;;  %v2059_v45 = vpack.c.bf16 %v1266_v28, %v1261_v42  ;;  %v1271_v48 = vld [vmem:[#allocation6 + $0x150] sm:$0xff]  ;;  %v1273_v31 = vld [vmem:[#allocation6 + $0x160] sm:$0xff]  ;;  %v1311_v42 = vlaneseq }
0x1657   :  { %v2093_v33 = vpack.c.bf16 %v1278_v32, %v1273_v31 }
0x1658   :  { %v1312_v28 = vshrl.u32 %v1311_v42, 7 }
0x1659   :  { %2020 = vmatpush1.bf16.msra.mxu0 %v2019_v49  ;;  %v1276_v49 = vld [vmem:[#allocation6 + $0x178] sm:$0xff] }
0x165a   :  { %2022 = vmatprep.subr.bf16.mxu0 %v2021_v52  ;;  %v2063_v52 = vpack.c.bf16 %v1276_v49, %v1271_v48  ;;  %v1313_v43 = vsub.s32 0, %v1312_v28  ;;  %v1321_v44 = vsub.s32 2, %v1312_v28  ;;  %v1325_v48 = vsub.s32 3, %v1312_v28 }
0x165d   :  { %2024 = vmatpush1.bf16.msra.mxu0 %v2023_v55  ;;  %v1286_v55 = vld [vmem:[#allocation6 + $0x1c8] sm:$0xff] }
0x165e   :  { %2026 = vmatprep.subr.bf16.mxu0 %v2025_v59  ;;  %v2067_v58 = vpack.c.bf16 %v1286_v55, %v1281_v54  ;;  %v2069_v59 = vpack.c.bf16 %v1297_v57, %v1292_v56 }
0x1661   :  { %2028 = vmatpush1.bf16.msra.mxu0 %v2027_v60  ;;  %v1296_v60 = vld [vmem:[#allocation6 + $0x218] sm:$0xff] }
0x1662   :  { %2030 = vmatprep.subr.bf16.mxu0 %v2029_v2  ;;  %v2071_v61 = vpack.c.bf16 %v1296_v60, %v1291_v26  ;;  %v2041_v2 = vpack.c.bf16 %v1305_v63, %v1300_v62 }
0x1665   :  { %2032 = vmatpush1.bf16.msra.mxu0 %v2031_v4  ;;  %v1304_v4 = vld [vmem:[#allocation6 + $0x258] sm:$0xff] }
0x1666   :  { %2034 = vmatprep.subr.bf16.mxu0 %v2033_v7  ;;  %v2043_v6 = vpack.c.bf16 %v1304_v4, %v1299_v3  ;;  %v1301_v7 = vld [vmem:[#allocation6 + $0x240] sm:$0xff] }
0x1669   :  { %2036 = vmatpush1.bf16.msra.mxu0 %v2035_v9  ;;  %v1306_v9 = vld [vmem:[#allocation6 + $0x268] sm:$0xff] }
0x166a   :  { %2038 = vmatprep.subr.bf16.mxu0 %v2037_v13  ;;  %v2075_v10 = vpack.c.bf16 %v1306_v9, %v1301_v7  ;;  %v2077_v13 = vpack.c.bf16 %v1238_v11, %v1233_v12 }
0x166d   :  { %2040 = vmatpush1.bf16.msra.mxu0 %v2039_v0 }
0x166e   :  { %2042 = vmatprep.subr.bf16.mxu0 %v2041_v2 }
0x1671   :  { %2044 = vmatpush1.bf16.msra.mxu0 %v2043_v6 }
0x1672   :  { %2078 = vmatprep.subr.bf16.mxu0 %v2077_v13 }
0x1727   :  { %v1838_v15 = vpop.f32.mrb[8].mxu0 }
0x1728   :  { %v1124_v16 = vadd.f32 %v1838_v15, %v1625_v17  ;;  %v1118_v18 = vpop.f32.mrb[9].mxu0  ;;  %v1243_v15 = vld [vmem:[#allocation6 + $0x70] sm:$0xff] }
0x1729   :  { %v1119_v21 = vadd.f32 %v1625_v17, %v1118_v18 }
0x172a   :  { %v1128_v27 = vmax.f32 %v1124_v16, 0.0  ;;  %v1248_v16 = vld [vmem:[#allocation6 + $0x98] sm:$0xff] }
0x172b   :  { %v1127_v24 = vmax.f32 %v1119_v21, 0.0  ;;  %v2081_v21 = vpack.c.bf16 %v1248_v16, %v1243_v15 }
0x172d   :  { %1871 = vmatprep.mubr.f32.mxu1 %v1127_v24 }
0x172e   :  { %1872 = vmatmul.mubr.f32.vlgmr.msra.gmra.mrb[10].mxu1 %v1128_v27  ;;  %v1263_v27 = vld [vmem:[#allocation6 + $0x110] sm:$0xff] }
0x172f   :  { %2048 = vmatpush1.bf16.msra.mxu1 %v2047_v25  ;;  %1477 = vmatprep.mubr.f32.mxu1 %v2280_v1  ;;  %v2085_v25 = vpack.c.bf16 %v1258_v23, %v1253_v22 }
0x1730   :  { %2050 = vmatprep.subr.bf16.mxu1 %v2049_v29  ;;  %v1268_v29 = vld [vmem:[#allocation6 + $0x138] sm:$0xff] }
0x1731   :  { %v2089_v30 = vpack.c.bf16 %v1268_v29, %v1263_v27 }
0x1733   :  { %2052 = vmatpush1.bf16.msra.mxu1 %v2051_v34  ;;  %v1283_v34 = vld [vmem:[#allocation6 + $0x1b0] sm:$0xff] }
0x1734   :  { %2054 = vmatprep.subr.bf16.mxu1 %v2053_v35  ;;  %v1288_v35 = vld [vmem:[#allocation6 + $0x1d8] sm:$0xff] }
0x1737   :  { %2056 = vmatpush1.bf16.msra.mxu1 %v2055_v40  ;;  %v1308_v40 = vld [vmem:[#allocation6 + $0x278] sm:$0xff] }
0x1738   :  { %2058 = vmatprep.subr.bf16.mxu1 %v2057_v41  ;;  %v2105_v41 = vpack.c.bf16 %v1308_v40, %v1303_v39 }
0x173b   :  { %2060 = vmatpush1.bf16.msra.mxu1 %v2059_v45  ;;  %v1309_v45 = vld [vmem:[%s2604_s9] sm:$0x1f] }
0x173c   :  { %2062 = vmatprep.subr.bf16.mxu1 %v2061_v47  ;;  %v1317_v47 = vsub.s32 1, %v1312_v28  ;;  %v1314_v49 = vrot.slane %v1309_v45, %v1313_v43  ;;  %v1322_v50 = vrot.slane %v1309_v45, %v1321_v44 }
0x173e   :  { %v1318_v51 = vrot.slane %v1309_v45, %v1317_v47 }
0x173f   :  { %2064 = vmatpush1.bf16.msra.mxu1 %v2063_v52  ;;  %v1326_v52 = vrot.slane %v1309_v45, %v1325_v48 }
0x1740   :  { %2066 = vmatprep.subr.bf16.mxu1 %v2065_v53 }
0x1743   :  { %2068 = vmatpush1.bf16.msra.mxu1 %v2067_v58 }
0x1744   :  { %2070 = vmatprep.subr.bf16.mxu1 %v2069_v59 }
0x1747   :  { %2072 = vmatpush1.bf16.msra.mxu1 %v2071_v61 }
0x1748   :  { %2074 = vmatprep.subr.bf16.mxu1 %v2073_v8 }
0x174b   :  { %2076 = vmatpush1.bf16.msra.mxu1 %v2075_v10 }
0x1801   :  { %v1873_v0 = vpop.f32.mrb[10].mxu1 }
0x1802   :  { %v1218_v17 = vpop.f32.mrb[11].mxu1  ;;  %v1224_v19 = vadd.f32 %v1873_v0, %v1628_v14 }
0x1803   :  { %v1219_v18 = vadd.f32 %v1628_v14, %v1218_v17 }
0x1804   :  { %v1228_v24 = vmax.f32 %v1224_v19, 0.0 }
0x1805   :  { %v1227_v20 = vmax.f32 %v1219_v18, 0.0 }
0x1807   :  { %1401 = vmatmul.mubr.f32.vlgmr.msra.gmra.mrb[10].mxu0 %v1227_v20  ;;  %1478 = vmatmul.mubr.f32.vlgmr.msra.gmra.mrb[12].mxu1 %v1227_v20 }
0x1808   :  { %2080 = vmatpush3.bf16.msra.mxu0 %v2077_v13  ;;  %1406 = vmatprep.mubr.f32.mxu0 %v2280_v1  ;;  %v1329_v13 = vsub.s32 4, %v1312_v28 }
0x1809   :  { %1483 = vmatprep.mubr.f32.mxu1 %v2280_v1  ;;  %2082 = vmatprep.subr.bf16.mxu0 %v2081_v21  ;;  %v2097_v1 = vpack.c.bf16 %v1288_v35, %v1283_v34 }
0x180a   :  { %v1330_v14 = vrot.slane %v1309_v45, %v1329_v13 }
0x180b   :  { %1407 = vmatmul.mubr.f32.gmra.mrb[12].mxu0 %v1228_v24  ;;  %1484 = vmatmul.mubr.f32.gmra.mrb[14].mxu1 %v1228_v24 }
0x180c   :  { %2084 = vmatpush3.bf16.msra.mxu0 %v2081_v21  ;;  %1906 = vmatprep.mubr.f32.mxu0 %v1227_v20 }
0x180d   :  { %2086 = vmatprep.subr.bf16.mxu0 %v2085_v25 }
0x1810   :  { %2088 = vmatpush3.bf16.msra.mxu0 %v2085_v25 }
0x1811   :  { %2090 = vmatprep.subr.bf16.mxu0 %v2089_v30 }
0x1814   :  { %2092 = vmatpush3.bf16.msra.mxu0 %v2089_v30 }
0x1815   :  { %2094 = vmatprep.subr.bf16.mxu0 %v2093_v33 }
0x1818   :  { %2096 = vmatpush3.bf16.msra.mxu0 %v2093_v33 }
0x1819   :  { %2098 = vmatprep.subr.bf16.mxu0 %v2097_v1 }
0x181c   :  { %2100 = vmatpush3.bf16.msra.mxu0 %v2097_v1 }
0x181d   :  { %2102 = vmatprep.subr.bf16.mxu0 %v2101_v38 }
0x1820   :  { %2104 = vmatpush3.bf16.msra.mxu0 %v2101_v38 }
0x1821   :  { %2106 = vmatprep.subr.bf16.mxu0 %v2105_v41 }
0x1824   :  { %2108 = vmatpush3.bf16.msra.mxu0 %v2105_v41 }
0x1827   :  { %1907 = vmatmul.mubr.f32.vlgmr.msra.gmra.mrb[14].mxu0 %v1228_v24 }
0x18da   :  { %v1402_v53 = vpop.f32.mrb[10].mxu0  ;;  %v1479_v54 = vpop.f32.mrb[12].mxu1 }
0x18db   :  { %v1403_v55 = vadd.f32 %v1402_v53, %v1314_v49  ;;  %v1480_v56 = vadd.f32 %v1479_v54, %v1322_v50  ;;  %v1404_v57 = vpop.f32.mrb[11].mxu0  ;;  %v1481_v58 = vpop.f32.mrb[13].mxu1 }
0x18dc   :  { %v1405_v59 = vadd.f32 %v1404_v57, %v1318_v51  ;;  %v1482_v26 = vadd.f32 %v1481_v58, %v1326_v52 }
0x18dd   :  { %v1587_v60 = vmul.f32 1.442695, %v1480_v56  ;;  %1565 = vmax.xlane.f32.xlu1 %v1403_v55 }
0x18de   :  { %v1585_v61 = vmul.f32 1.442695, %v1405_v59  ;;  %1597 = vst [vmem:[%s2605_s10 + $0x18] sm:$0xff] %v1482_v26  ;;  %v1408_v62 = vpop.f32.mrb[12].mxu0  ;;  %v1485_v63 = vpop.f32.mrb[14].mxu1 }
0x18df   :  { %2185 = vpow2.f32 %v1587_v60  ;;  %v1409_v2 = vadd.f32 %v1408_v62, %v1314_v49  ;;  %v1486_v3 = vadd.f32 %v1485_v63, %v1322_v50  ;;  %v1410_v4 = vpop.f32.mrb[13].mxu0  ;;  %v1487_v5 = vpop.f32.mrb[15].mxu1 }
0x18e0   :  { %2187 = vpow2.f32 %v1585_v61  ;;  %v1411_v6 = vadd.f32 %v1410_v4, %v1318_v51  ;;  %v1488_v46 = vadd.f32 %v1487_v5, %v1326_v52 }
0x18e1   :  { %v1591_v7 = vmul.f32 1.442695, %v1486_v3  ;;  %1567 = vmax.xlane.f32.xlu0 %v1409_v2 }
0x18e2   :  { %v1589_v8 = vmul.f32 1.442695, %v1411_v6  ;;  %1599 = vst [vmem:[%s2605_s10 + $0x40] sm:$0xff] %v1488_v46 }
0x18e3   :  { %2189 = vpow2.f32 %v1591_v7 }
0x18e4   :  { %2191 = vpow2.f32 %v1589_v8 }
0x18e9   :  { %v2186_v9 = vpop.eup %2185 }
0x18ea   :  { %v2188_v10 = vpop.eup %2187  ;;  %1594 = vst [vmem:[%s2605_s10 + $0x10] sm:$0xff] %v2186_v9 }
0x18eb   :  { %1593 = vst [vmem:[%s2605_s10 + $0x8] sm:$0xff] %v2188_v10 }
0x18ed   :  { %v2190_v12 = vpop.eup %2189 }
0x18ee   :  { %v2192_v11 = vpop.eup %2191  ;;  %1596 = vst [vmem:[%s2605_s10 + $0x38] sm:$0xff] %v2190_v12 }
0x18ef   :  { %1595 = vst [vmem:[%s2605_s10 + $0x30] sm:$0xff] %v2192_v11 }
0x18fa   :  { %v1908_v0 = vpop.f32.mrb[14].mxu0 }
0x18fb   :  { %v1562_v17 = vadd.f32 %v1908_v0, %v1330_v14  ;;  %v1556_v15 = vpop.f32.mrb[15].mxu0 }
0x18fc   :  { %v1557_v16 = vadd.f32 %v1556_v15, %v1330_v14 }
0x18fd   :  { %1600 = vst [vmem:[%s2605_s10 + $0x48] sm:$0xff] %v1562_v17 }
0x18fe   :  { %1598 = vst [vmem:[%s2605_s10 + $0x20] sm:$0xff] %v1557_v16 }
0x196a   :  { %v1566_v18 = vpop.xlane.xlu1 %1565 }
0x196b   :  { %v1569_v19 = vsub.f32 %v1403_v55, %v1566_v18 }
0x196d   :  { %v1571_v20 = vmul.f32 1.442695, %v1569_v19 }
0x196e   :  { %v1568_v21 = vpop.xlane.xlu0 %1567 }
0x196f   :  { %2193 = vpow2.f32 %v1571_v20  ;;  %v1570_v22 = vsub.f32 %v1409_v2, %v1568_v21 }
0x1971   :  { %v1573_v23 = vmul.f32 1.442695, %v1570_v22 }
0x1973   :  { %2195 = vpow2.f32 %v1573_v23 }
0x1979   :  { %v2194_v24 = vpop.eup %2193 }
0x197a   :  { %1575 = vadd.xlane.f32.xlu0 %v2194_v24 }
0x197d   :  { %v2196_v25 = vpop.eup %2195 }
0x197e   :  { %1577 = vadd.xlane.f32.xlu1 %v2196_v25 }
0x1a07   :  { %v1576_v27 = vpop.xlane.xlu0 %1575 }
0x1a08   :  { %2197 = vrcp.f32 %v1576_v27 }
0x1a0b   :  { %v1578_v29 = vpop.xlane.xlu1 %1577 }
0x1a0c   :  { %2199 = vrcp.f32 %v1578_v29 }
0x1a12   :  { %v2198_v30 = vpop.eup %2197 }
0x1a13   :  { %v1581_v31 = vmul.f32 %v2198_v30, %v2194_v24 }
0x1a15   :  { %1583 = vst [vmem:[%s2605_s10] sm:$0xff] %v1581_v31 }
0x1a16   :  { %v2200_v32 = vpop.eup %2199 }
0x1a17   :  { %v1582_v33 = vmul.f32 %v2200_v32, %v2196_v25 }
0x1a19   :  { %1584 = vst [vmem:[%s2605_s10 + $0x28] sm:$0xff] %v1582_v33 }
0x1a1a   :  { %1605 = vsyncpa [#allocation3], 1 }
0x1a1b   :  { %1606 = vsyncpa [#allocation5], 1 }

</bundles_post_ra>
